<compile_context>
chip_gen: v6e
topology: v6e:2x2x1
jax: 0.10.0
libtpu: 0.0.40
codegen_flags: <defaults>
</compile_context>

<pallas_src>
import functools

import jax
import jax.numpy as jnp
from jax.experimental import pallas as pl
from jax.experimental.pallas import tpu as pltpu


def _sigmoid(z):
    # sigmoid(z) = 0.5 * (1 + tanh(z/2)): one EUP transcendental, no VALU divide.
    return 0.5 * (jnp.tanh(0.5 * z) + 1.0)


def cnn_bilstm_kernel(
    xwin_ref,      # (2*T*B_pad, K+1)  conv windows + ones column, [even ; odd], row = t*B_pad + b
    conv_ref,      # (K+1, H)          rows 0:K conv weight (K,H), row K = conv bias
    w_ref,         # (3H, 4H)          rows [0:H]=Wih_f, [H:2H]=Whh_f, [2H:3H]=Wih_r  (i,f,g,o)
    b_ref,         # (2, 4H)           row 0 = b_f (b_ih+b_hh), row 1 = b_r
    fc_ref,        # (2H+1, C_pad)     rows 0:2H fc weight (transposed), row 2H fc bias
    out_ref,       # (B_pad, C_pad)
    gx_ref,        # VMEM scratch (T*B_pad, 4H): hoisted input->hidden gate pre-activations
    *, B_pad, T, H,
):
    TB = T * B_pad

    # ---- Conv1d(k=3) + bias + ReLU as ONE im2col matmul over all (even|odd) windows.
    #      Bias is folded in via the ones column of xwin and the last row of conv_ref.
    conv = jnp.maximum(
        jnp.dot(xwin_ref[...], conv_ref[...], preferred_element_type=jnp.float32), 0.0
    )                                                      # (2*TB, H)

    # ---- MaxPool1d(2): one elementwise max of the two sublane-aligned halves.
    pooled = jnp.maximum(conv[:TB, :], conv[TB:, :])       # (TB, H), row = t*B_pad + b

    # ---- Static slices of the packed weight/bias slabs (all sublane-aligned).
    wih_f = w_ref[:H, :]
    whh_f = w_ref[H:2 * H, :]
    wih_r = w_ref[2 * H:, :]
    b_f = b_ref[0:1, :]
    b_r = b_ref[1:2, :]

    # ---- Hoisted input->hidden projection + bias for the forward LSTM (one big matmul).
    gx_ref[...] = (
        jnp.dot(pooled, wih_f, preferred_element_type=jnp.float32) + b_f
    )                                                      # (TB, 4H)

    # ---- Forward LSTM recurrence: only h @ Whh_f stays on the serial path.
    #      Gate column order is torch's (i, f, g, o): the c-path (i, f, g) is consumed first,
    #      the o-gate sigmoid and tanh(c) overlap with the tail of the gate matmul.
    def step(t, carry):
        h, c = carry
        start = pl.multiple_of(t * B_pad, B_pad)
        gates = gx_ref[pl.ds(start, B_pad), :] + jnp.dot(
            h, whh_f, preferred_element_type=jnp.float32)  # (B_pad, 4H)
        i_f = _sigmoid(gates[:, : 2 * H])                  # i | f
        g = jnp.tanh(gates[:, 2 * H:3 * H])
        c = i_f[:, H:] * c + i_f[:, :H] * g
        o = _sigmoid(gates[:, 3 * H:])
        h = o * jnp.tanh(c)
        return h, c

    h0 = jnp.zeros((B_pad, H), jnp.float32)
    c0 = jnp.zeros((B_pad, H), jnp.float32)
    # T is small and static: fully unroll for cross-iteration LLO scheduling visibility.
    h_fwd, _ = jax.lax.fori_loop(0, T, step, (h0, c0), unroll=True)

    # ---- Reverse direction at output index T-1 == its FIRST step from the zero state.
    #      h0 = c0 = 0  =>  the Whh_reverse term vanishes and c_new = i*g.  Correct ONLY
    #      because the module consumes just the last timestep of the BiLSTM output.
    x_last = pooled[(T - 1) * B_pad:, :]                   # (B_pad, H), static aligned slice
    gates_r = jnp.dot(x_last, wih_r, preferred_element_type=jnp.float32) + b_r
    i_r = _sigmoid(gates_r[:, :H])
    g_r = jnp.tanh(gates_r[:, 2 * H:3 * H])
    o_r = _sigmoid(gates_r[:, 3 * H:])
    h_bwd = o_r * jnp.tanh(i_r * g_r)

    # ---- Final Linear: split matmul instead of a lane concatenate of (h_fwd, h_bwd).
    out_ref[...] = (
        jnp.dot(h_fwd, fc_ref[:H, :], preferred_element_type=jnp.float32)
        + jnp.dot(h_bwd, fc_ref[H:2 * H, :], preferred_element_type=jnp.float32)
        + fc_ref[2 * H:, :]
    )


def prepare_params(params, *, num_classes):
    """One-time parameter packing (keeps static weight plumbing out of the per-call path)."""
    H = 64
    C_pad = max(128, ((num_classes + 127) // 128) * 128)
    conv_slab = jnp.concatenate(
        [params["w_conv"], params["b_conv"]], axis=0).astype(jnp.float32)       # (K+1, H)
    w_slab = jnp.concatenate(
        [params["wih_f"], params["whh_f"], params["wih_r"]], axis=0).astype(jnp.float32)
    b_slab = jnp.concatenate([params["b_f"], params["b_r"]], axis=0).astype(jnp.float32)
    wfc = jnp.pad(params["w_fc"], ((0, 0), (0, C_pad - num_classes)))
    bfc = jnp.pad(params["b_fc"], ((0, 0), (0, C_pad - num_classes)))
    fc_slab = jnp.concatenate([wfc, bfc], axis=0).astype(jnp.float32)           # (2H+1, C_pad)
    # params["whh_r"] drops out exactly: reverse h0 = 0 and only the last output step is used.
    return dict(conv=conv_slab, w=w_slab, b=b_slab, fc=fc_slab)


def cnn_bilstm_forward(x, prepared, *, num_classes):
    """x: (B, L, 1) float32 -> logits (B, num_classes)."""
    B, L, cin = x.shape
    assert cin == 1
    K, H = 3, 64
    Tc = L - K + 1
    assert Tc >= 2, "need at least 2 conv outputs for MaxPool1d(2)"
    T = Tc // 2  # MaxPool1d(2) output length (odd trailing conv frame dropped, as in torch)

    B_pad = max(8, ((B + 7) // 8) * 8)
    C_pad = prepared["fc"].shape[1]

    # ---- glue (plain JAX): batch pad + im2col with even/odd halves, row = t*B_pad + b ----
    xs = jnp.pad(x[..., 0].astype(jnp.float32), ((0, B_pad - B), (0, 0)))       # (B_pad, L)

    def windows(offset):
        # (T*B_pad, K): row t*B_pad + b, col k  ->  xs[b, 2t + offset + k]
        cols = [xs[:, offset + k: offset + k + 2 * (T - 1) + 1: 2] for k in range(K)]
        w = jnp.stack(cols, axis=-1)                       # (B_pad, T, K)
        return jnp.transpose(w, (1, 0, 2)).reshape(T * B_pad, K)

    xwin = jnp.concatenate([windows(0), windows(1)], axis=0)                    # (2*T*B_pad, K)
    # Ones column folds the conv bias into the im2col matmul.
    xwin = jnp.concatenate([xwin, jnp.ones((2 * T * B_pad, 1), jnp.float32)], axis=-1)

    kernel = functools.partial(cnn_bilstm_kernel, B_pad=B_pad, T=T, H=H)
    vmem = pl.BlockSpec(memory_space=pltpu.MemorySpace.VMEM)
    args = (xwin, prepared["conv"], prepared["w"], prepared["b"], prepared["fc"])

    out_pad = pl.pallas_call(
        kernel,
        out_shape=jax.ShapeDtypeStruct((B_pad, C_pad), jnp.float32),
        in_specs=[vmem] * len(args),
        out_specs=vmem,
        scratch_shapes=[pltpu.VMEM((T * B_pad, 4 * H), jnp.float32)],
        compiler_params=pltpu.CompilerParams(vmem_limit_bytes=32 * 1024 * 1024),
    )(*args)
    return out_pad[:B, :num_classes]


def reference_forward(x, params):
    """Pure-JAX mirror of the PyTorch CNN_BiLSTM.forward (full BiLSTM sweep, torch gate order)."""
    B, L, _ = x.shape
    K, H = 3, 64
    Tc = L - K + 1
    T = Tc // 2
    xs = x[..., 0]
    win = jnp.stack([xs[:, k:k + Tc] for k in range(K)], axis=-1)               # (B, Tc, K)
    conv = jnp.einsum("btk,kc->btc", win, params["w_conv"]) + params["b_conv"]
    conv = jax.nn.relu(conv)
    pooled = conv[:, :2 * T, :].reshape(B, T, 2, H).max(axis=2)                 # (B, T, H)

    def make_step(wih, whh, b):
        def step(carry, xt):
            h, c = carry
            gates = xt @ wih + h @ whh + b
            i, f, g, o = jnp.split(gates, 4, axis=-1)
            i, f, g, o = jax.nn.sigmoid(i), jax.nn.sigmoid(f), jnp.tanh(g), jax.nn.sigmoid(o)
            c = f * c + i * g
            h = o * jnp.tanh(c)
            return (h, c), h
        return step

    h0 = jnp.zeros((B, H), jnp.float32)
    c0 = jnp.zeros((B, H), jnp.float32)
    seq = jnp.swapaxes(pooled, 0, 1)                                            # (T, B, H)
    _, hs_f = jax.lax.scan(make_step(params["wih_f"], params["whh_f"], params["b_f"]),
                           (h0, c0), seq)
    _, hs_b = jax.lax.scan(make_step(params["wih_r"], params["whh_r"], params["b_r"]),
                           (h0, c0), seq[::-1])
    hs_b = hs_b[::-1]
    out_seq = jnp.concatenate([hs_f, hs_b], axis=-1)                            # (T, B, 2H)
    return out_seq[-1] @ params["w_fc"] + params["b_fc"]


if __name__ == "__main__":
    B, L, num_classes = 2, 16, 5
    H = 64
    key = jax.random.PRNGKey(0)
    ks = jax.random.split(key, 12)

    def unif(k, shape, fan_in):
        bound = 1.0 / float(fan_in) ** 0.5
        return jax.random.uniform(k, shape, jnp.float32, -bound, bound)

    params = dict(
        w_conv=unif(ks[0], (3, 64), 3),          # torch conv1.weight (64,1,3) transposed
        b_conv=unif(ks[1], (1, 64), 3),
        wih_f=unif(ks[2], (64, 4 * H), H),       # torch weight_ih_l0 (256,64) transposed
        whh_f=unif(ks[3], (H, 4 * H), H),
        b_f=unif(ks[4], (1, 4 * H), H),          # b_ih + b_hh combined
        wih_r=unif(ks[5], (64, 4 * H), H),
        whh_r=unif(ks[6], (H, 4 * H), H),
        b_r=unif(ks[7], (1, 4 * H), H),
        w_fc=unif(ks[8], (2 * H, num_classes), 2 * H),
        b_fc=unif(ks[9], (1, num_classes), 2 * H),
    )
    x = jax.random.normal(ks[10], (B, L, 1), jnp.float32)

    # One-time parameter packing, then a jitted per-call path.
    prepared = jax.tree_util.tree_map(jax.block_until_ready,
                                      prepare_params(params, num_classes=num_classes))
    fwd = jax.jit(functools.partial(cnn_bilstm_forward, num_classes=num_classes))

    out = fwd(x, prepared)
    out = jax.block_until_ready(out)

    ref = reference_forward(x, params)
    assert out.shape == (B, num_classes)
    assert jnp.allclose(out, ref, atol=1e-4, rtol=1e-4), (out, ref)
    print("KERNEL_OK")
</pallas_src>

<mosaic_0001>
module attributes {stable_mosaic.version = 11 : i64} {
  func.func @cnn_bilstm_kernel(%arg0: memref<112x4xf32, #tpu.memory_space<vmem>>, %arg1: memref<4x64xf32, #tpu.memory_space<vmem>>, %arg2: memref<192x256xf32, #tpu.memory_space<vmem>>, %arg3: memref<2x256xf32, #tpu.memory_space<vmem>>, %arg4: memref<129x128xf32, #tpu.memory_space<vmem>>, %arg5: memref<8x128xf32, #tpu.memory_space<vmem>>, %arg6: memref<56x256xf32, #tpu.memory_space<vmem>>) attributes {dimension_semantics = [], scalar_prefetch = 0 : i64, scratch_operands = 1 : i64, tpu.core_type = #tpu.core_type<tc>} {
    %c0 = arith.constant 0 : index
    %c0_0 = arith.constant 0 : index
    %0 = vector.load %arg0[%c0, %c0_0] : memref<112x4xf32, #tpu.memory_space<vmem>>, vector<112x4xf32>
    %c0_1 = arith.constant 0 : index
    %c0_2 = arith.constant 0 : index
    %1 = vector.load %arg1[%c0_1, %c0_2] : memref<4x64xf32, #tpu.memory_space<vmem>>, vector<4x64xf32>
    %cst = arith.constant dense<0.000000e+00> : vector<112x64xf32>
    %2 = tpu.matmul %0, %1, %cst {dimension_numbers = #tpu.dot_dimension_numbers<[1], [0], [0], [1], [0, 0, 1, 1], [], []>} : vector<112x4xf32>, vector<4x64xf32>, vector<112x64xf32> -> vector<112x64xf32>
    %cst_3 = arith.constant 0.000000e+00 : f32
    %3 = vector.broadcast %cst_3 : f32 to vector<112x64xf32>
    %4 = arith.maximumf %2, %3 : vector<112x64xf32>
    %5 = vector.extract_strided_slice %4 {offsets = [0, 0], sizes = [56, 64], strides = [1, 1]} : vector<112x64xf32> to vector<56x64xf32>
    %6 = vector.extract_strided_slice %4 {offsets = [56, 0], sizes = [56, 64], strides = [1, 1]} : vector<112x64xf32> to vector<56x64xf32>
    %7 = arith.maximumf %5, %6 : vector<56x64xf32>
    %c0_4 = arith.constant 0 : index
    %c0_5 = arith.constant 0 : index
    %8 = vector.load %arg2[%c0_4, %c0_5] : memref<192x256xf32, #tpu.memory_space<vmem>>, vector<64x256xf32>
    %c64 = arith.constant 64 : index
    %c0_6 = arith.constant 0 : index
    %9 = vector.load %arg2[%c64, %c0_6] : memref<192x256xf32, #tpu.memory_space<vmem>>, vector<64x256xf32>
    %c128 = arith.constant 128 : index
    %c0_7 = arith.constant 0 : index
    %10 = vector.load %arg2[%c128, %c0_7] : memref<192x256xf32, #tpu.memory_space<vmem>>, vector<64x256xf32>
    %c0_8 = arith.constant 0 : index
    %c0_9 = arith.constant 0 : index
    %11 = vector.load %arg3[%c0_8, %c0_9] : memref<2x256xf32, #tpu.memory_space<vmem>>, vector<1x256xf32>
    %c1 = arith.constant 1 : index
    %c0_10 = arith.constant 0 : index
    %12 = vector.load %arg3[%c1, %c0_10] : memref<2x256xf32, #tpu.memory_space<vmem>>, vector<1x256xf32>
    %cst_11 = arith.constant dense<0.000000e+00> : vector<56x256xf32>
    %13 = tpu.matmul %7, %8, %cst_11 {dimension_numbers = #tpu.dot_dimension_numbers<[1], [0], [0], [1], [0, 0, 1, 1], [], []>} : vector<56x64xf32>, vector<64x256xf32>, vector<56x256xf32> -> vector<56x256xf32>
    %14 = vector.broadcast %11 : vector<1x256xf32> to vector<56x256xf32>
    %15 = arith.addf %13, %14 : vector<56x256xf32>
    %c0_12 = arith.constant 0 : index
    %c0_13 = arith.constant 0 : index
    %16 = vector.load %arg6[%c0_12, %c0_13] : memref<56x256xf32, #tpu.memory_space<vmem>>, vector<56x256xf32>
    tpu.vector_store %arg6[%c0_12, %c0_13], %15 {strides = array<i32>} : memref<56x256xf32, #tpu.memory_space<vmem>>, vector<56x256xf32>,
    %cst_14 = arith.constant 0.000000e+00 : f32
    %17 = vector.broadcast %cst_14 : f32 to vector<8x64xf32>
    %cst_15 = arith.constant 0.000000e+00 : f32
    %18 = vector.broadcast %cst_15 : f32 to vector<8x64xf32>
    %c0_i32 = arith.constant 0 : i32
    %c8_i32 = arith.constant 8 : i32
    %19 = arith.muli %c0_i32, %c8_i32 : i32
    %20 = tpu.assume_multiple %19, 8 : i32
    %21 = arith.index_cast %20 : i32 to index
    %c0_16 = arith.constant 0 : index
    %22 = vector.load %arg6[%21, %c0_16] : memref<56x256xf32, #tpu.memory_space<vmem>>, vector<8x256xf32>
    %cst_17 = arith.constant dense<0.000000e+00> : vector<8x256xf32>
    %23 = tpu.matmul %17, %9, %cst_17 {dimension_numbers = #tpu.dot_dimension_numbers<[1], [0], [0], [1], [0, 0, 1, 1], [], []>} : vector<8x64xf32>, vector<64x256xf32>, vector<8x256xf32> -> vector<8x256xf32>
    %24 = arith.addf %22, %23 : vector<8x256xf32>
    %25 = vector.extract_strided_slice %24 {offsets = [0, 0], sizes = [8, 128], strides = [1, 1]} : vector<8x256xf32> to vector<8x128xf32>
    %cst_18 = arith.constant 5.000000e-01 : f32
    %26 = vector.broadcast %cst_18 : f32 to vector<8x128xf32>
    %27 = arith.mulf %26, %25 : vector<8x128xf32>
    %28 = math.tanh %27 : vector<8x128xf32>
    %cst_19 = arith.constant 1.000000e+00 : f32
    %29 = vector.broadcast %cst_19 : f32 to vector<8x128xf32>
    %30 = arith.addf %28, %29 : vector<8x128xf32>
    %cst_20 = arith.constant 5.000000e-01 : f32
    %31 = vector.broadcast %cst_20 : f32 to vector<8x128xf32>
    %32 = arith.mulf %31, %30 : vector<8x128xf32>
    %33 = vector.extract_strided_slice %24 {offsets = [0, 128], sizes = [8, 64], strides = [1, 1]} : vector<8x256xf32> to vector<8x64xf32>
    %34 = math.tanh %33 : vector<8x64xf32>
    %35 = vector.extract_strided_slice %32 {offsets = [0, 64], sizes = [8, 64], strides = [1, 1]} : vector<8x128xf32> to vector<8x64xf32>
    %36 = arith.mulf %35, %18 : vector<8x64xf32>
    %37 = vector.extract_strided_slice %32 {offsets = [0, 0], sizes = [8, 64], strides = [1, 1]} : vector<8x128xf32> to vector<8x64xf32>
    %38 = arith.mulf %37, %34 : vector<8x64xf32>
    %39 = arith.addf %36, %38 : vector<8x64xf32>
    %40 = vector.extract_strided_slice %24 {offsets = [0, 192], sizes = [8, 64], strides = [1, 1]} : vector<8x256xf32> to vector<8x64xf32>
    %cst_21 = arith.constant 5.000000e-01 : f32
    %41 = vector.broadcast %cst_21 : f32 to vector<8x64xf32>
    %42 = arith.mulf %41, %40 : vector<8x64xf32>
    %43 = math.tanh %42 : vector<8x64xf32>
    %cst_22 = arith.constant 1.000000e+00 : f32
    %44 = vector.broadcast %cst_22 : f32 to vector<8x64xf32>
    %45 = arith.addf %43, %44 : vector<8x64xf32>
    %cst_23 = arith.constant 5.000000e-01 : f32
    %46 = vector.broadcast %cst_23 : f32 to vector<8x64xf32>
    %47 = arith.mulf %46, %45 : vector<8x64xf32>
    %48 = math.tanh %39 : vector<8x64xf32>
    %49 = arith.mulf %47, %48 : vector<8x64xf32>
    %c1_i32 = arith.constant 1 : i32
    %c8_i32_24 = arith.constant 8 : i32
    %50 = arith.muli %c1_i32, %c8_i32_24 : i32
    %51 = tpu.assume_multiple %50, 8 : i32
    %52 = arith.index_cast %51 : i32 to index
    %c0_25 = arith.constant 0 : index
    %53 = vector.load %arg6[%52, %c0_25] : memref<56x256xf32, #tpu.memory_space<vmem>>, vector<8x256xf32>
    %cst_26 = arith.constant dense<0.000000e+00> : vector<8x256xf32>
    %54 = tpu.matmul %49, %9, %cst_26 {dimension_numbers = #tpu.dot_dimension_numbers<[1], [0], [0], [1], [0, 0, 1, 1], [], []>} : vector<8x64xf32>, vector<64x256xf32>, vector<8x256xf32> -> vector<8x256xf32>
    %55 = arith.addf %53, %54 : vector<8x256xf32>
    %56 = vector.extract_strided_slice %55 {offsets = [0, 0], sizes = [8, 128], strides = [1, 1]} : vector<8x256xf32> to vector<8x128xf32>
    %cst_27 = arith.constant 5.000000e-01 : f32
    %57 = vector.broadcast %cst_27 : f32 to vector<8x128xf32>
    %58 = arith.mulf %57, %56 : vector<8x128xf32>
    %59 = math.tanh %58 : vector<8x128xf32>
    %cst_28 = arith.constant 1.000000e+00 : f32
    %60 = vector.broadcast %cst_28 : f32 to vector<8x128xf32>
    %61 = arith.addf %59, %60 : vector<8x128xf32>
    %cst_29 = arith.constant 5.000000e-01 : f32
    %62 = vector.broadcast %cst_29 : f32 to vector<8x128xf32>
    %63 = arith.mulf %62, %61 : vector<8x128xf32>
    %64 = vector.extract_strided_slice %55 {offsets = [0, 128], sizes = [8, 64], strides = [1, 1]} : vector<8x256xf32> to vector<8x64xf32>
    %65 = math.tanh %64 : vector<8x64xf32>
    %66 = vector.extract_strided_slice %63 {offsets = [0, 64], sizes = [8, 64], strides = [1, 1]} : vector<8x128xf32> to vector<8x64xf32>
    %67 = arith.mulf %66, %39 : vector<8x64xf32>
    %68 = vector.extract_strided_slice %63 {offsets = [0, 0], sizes = [8, 64], strides = [1, 1]} : vector<8x128xf32> to vector<8x64xf32>
    %69 = arith.mulf %68, %65 : vector<8x64xf32>
    %70 = arith.addf %67, %69 : vector<8x64xf32>
    %71 = vector.extract_strided_slice %55 {offsets = [0, 192], sizes = [8, 64], strides = [1, 1]} : vector<8x256xf32> to vector<8x64xf32>
    %cst_30 = arith.constant 5.000000e-01 : f32
    %72 = vector.broadcast %cst_30 : f32 to vector<8x64xf32>
    %73 = arith.mulf %72, %71 : vector<8x64xf32>
    %74 = math.tanh %73 : vector<8x64xf32>
    %cst_31 = arith.constant 1.000000e+00 : f32
    %75 = vector.broadcast %cst_31 : f32 to vector<8x64xf32>
    %76 = arith.addf %74, %75 : vector<8x64xf32>
    %cst_32 = arith.constant 5.000000e-01 : f32
    %77 = vector.broadcast %cst_32 : f32 to vector<8x64xf32>
    %78 = arith.mulf %77, %76 : vector<8x64xf32>
    %79 = math.tanh %70 : vector<8x64xf32>
    %80 = arith.mulf %78, %79 : vector<8x64xf32>
    %c2_i32 = arith.constant 2 : i32
    %c8_i32_33 = arith.constant 8 : i32
    %81 = arith.muli %c2_i32, %c8_i32_33 : i32
    %82 = tpu.assume_multiple %81, 8 : i32
    %83 = arith.index_cast %82 : i32 to index
    %c0_34 = arith.constant 0 : index
    %84 = vector.load %arg6[%83, %c0_34] : memref<56x256xf32, #tpu.memory_space<vmem>>, vector<8x256xf32>
    %cst_35 = arith.constant dense<0.000000e+00> : vector<8x256xf32>
    %85 = tpu.matmul %80, %9, %cst_35 {dimension_numbers = #tpu.dot_dimension_numbers<[1], [0], [0], [1], [0, 0, 1, 1], [], []>} : vector<8x64xf32>, vector<64x256xf32>, vector<8x256xf32> -> vector<8x256xf32>
    %86 = arith.addf %84, %85 : vector<8x256xf32>
    %87 = vector.extract_strided_slice %86 {offsets = [0, 0], sizes = [8, 128], strides = [1, 1]} : vector<8x256xf32> to vector<8x128xf32>
    %cst_36 = arith.constant 5.000000e-01 : f32
    %88 = vector.broadcast %cst_36 : f32 to vector<8x128xf32>
    %89 = arith.mulf %88, %87 : vector<8x128xf32>
    %90 = math.tanh %89 : vector<8x128xf32>
    %cst_37 = arith.constant 1.000000e+00 : f32
    %91 = vector.broadcast %cst_37 : f32 to vector<8x128xf32>
    %92 = arith.addf %90, %91 : vector<8x128xf32>
    %cst_38 = arith.constant 5.000000e-01 : f32
    %93 = vector.broadcast %cst_38 : f32 to vector<8x128xf32>
    %94 = arith.mulf %93, %92 : vector<8x128xf32>
    %95 = vector.extract_strided_slice %86 {offsets = [0, 128], sizes = [8, 64], strides = [1, 1]} : vector<8x256xf32> to vector<8x64xf32>
    %96 = math.tanh %95 : vector<8x64xf32>
    %97 = vector.extract_strided_slice %94 {offsets = [0, 64], sizes = [8, 64], strides = [1, 1]} : vector<8x128xf32> to vector<8x64xf32>
    %98 = arith.mulf %97, %70 : vector<8x64xf32>
    %99 = vector.extract_strided_slice %94 {offsets = [0, 0], sizes = [8, 64], strides = [1, 1]} : vector<8x128xf32> to vector<8x64xf32>
    %100 = arith.mulf %99, %96 : vector<8x64xf32>
    %101 = arith.addf %98, %100 : vector<8x64xf32>
    %102 = vector.extract_strided_slice %86 {offsets = [0, 192], sizes = [8, 64], strides = [1, 1]} : vector<8x256xf32> to vector<8x64xf32>
    %cst_39 = arith.constant 5.000000e-01 : f32
    %103 = vector.broadcast %cst_39 : f32 to vector<8x64xf32>
    %104 = arith.mulf %103, %102 : vector<8x64xf32>
    %105 = math.tanh %104 : vector<8x64xf32>
    %cst_40 = arith.constant 1.000000e+00 : f32
    %106 = vector.broadcast %cst_40 : f32 to vector<8x64xf32>
    %107 = arith.addf %105, %106 : vector<8x64xf32>
    %cst_41 = arith.constant 5.000000e-01 : f32
    %108 = vector.broadcast %cst_41 : f32 to vector<8x64xf32>
    %109 = arith.mulf %108, %107 : vector<8x64xf32>
    %110 = math.tanh %101 : vector<8x64xf32>
    %111 = arith.mulf %109, %110 : vector<8x64xf32>
    %c3_i32 = arith.constant 3 : i32
    %c8_i32_42 = arith.constant 8 : i32
    %112 = arith.muli %c3_i32, %c8_i32_42 : i32
    %113 = tpu.assume_multiple %112, 8 : i32
    %114 = arith.index_cast %113 : i32 to index
    %c0_43 = arith.constant 0 : index
    %115 = vector.load %arg6[%114, %c0_43] : memref<56x256xf32, #tpu.memory_space<vmem>>, vector<8x256xf32>
    %cst_44 = arith.constant dense<0.000000e+00> : vector<8x256xf32>
    %116 = tpu.matmul %111, %9, %cst_44 {dimension_numbers = #tpu.dot_dimension_numbers<[1], [0], [0], [1], [0, 0, 1, 1], [], []>} : vector<8x64xf32>, vector<64x256xf32>, vector<8x256xf32> -> vector<8x256xf32>
    %117 = arith.addf %115, %116 : vector<8x256xf32>
    %118 = vector.extract_strided_slice %117 {offsets = [0, 0], sizes = [8, 128], strides = [1, 1]} : vector<8x256xf32> to vector<8x128xf32>
    %cst_45 = arith.constant 5.000000e-01 : f32
    %119 = vector.broadcast %cst_45 : f32 to vector<8x128xf32>
    %120 = arith.mulf %119, %118 : vector<8x128xf32>
    %121 = math.tanh %120 : vector<8x128xf32>
    %cst_46 = arith.constant 1.000000e+00 : f32
    %122 = vector.broadcast %cst_46 : f32 to vector<8x128xf32>
    %123 = arith.addf %121, %122 : vector<8x128xf32>
    %cst_47 = arith.constant 5.000000e-01 : f32
    %124 = vector.broadcast %cst_47 : f32 to vector<8x128xf32>
    %125 = arith.mulf %124, %123 : vector<8x128xf32>
    %126 = vector.extract_strided_slice %117 {offsets = [0, 128], sizes = [8, 64], strides = [1, 1]} : vector<8x256xf32> to vector<8x64xf32>
    %127 = math.tanh %126 : vector<8x64xf32>
    %128 = vector.extract_strided_slice %125 {offsets = [0, 64], sizes = [8, 64], strides = [1, 1]} : vector<8x128xf32> to vector<8x64xf32>
    %129 = arith.mulf %128, %101 : vector<8x64xf32>
    %130 = vector.extract_strided_slice %125 {offsets = [0, 0], sizes = [8, 64], strides = [1, 1]} : vector<8x128xf32> to vector<8x64xf32>
    %131 = arith.mulf %130, %127 : vector<8x64xf32>
    %132 = arith.addf %129, %131 : vector<8x64xf32>
    %133 = vector.extract_strided_slice %117 {offsets = [0, 192], sizes = [8, 64], strides = [1, 1]} : vector<8x256xf32> to vector<8x64xf32>
    %cst_48 = arith.constant 5.000000e-01 : f32
    %134 = vector.broadcast %cst_48 : f32 to vector<8x64xf32>
    %135 = arith.mulf %134, %133 : vector<8x64xf32>
    %136 = math.tanh %135 : vector<8x64xf32>
    %cst_49 = arith.constant 1.000000e+00 : f32
    %137 = vector.broadcast %cst_49 : f32 to vector<8x64xf32>
    %138 = arith.addf %136, %137 : vector<8x64xf32>
    %cst_50 = arith.constant 5.000000e-01 : f32
    %139 = vector.broadcast %cst_50 : f32 to vector<8x64xf32>
    %140 = arith.mulf %139, %138 : vector<8x64xf32>
    %141 = math.tanh %132 : vector<8x64xf32>
    %142 = arith.mulf %140, %141 : vector<8x64xf32>
    %c4_i32 = arith.constant 4 : i32
    %c8_i32_51 = arith.constant 8 : i32
    %143 = arith.muli %c4_i32, %c8_i32_51 : i32
    %144 = tpu.assume_multiple %143, 8 : i32
    %145 = arith.index_cast %144 : i32 to index
    %c0_52 = arith.constant 0 : index
    %146 = vector.load %arg6[%145, %c0_52] : memref<56x256xf32, #tpu.memory_space<vmem>>, vector<8x256xf32>
    %cst_53 = arith.constant dense<0.000000e+00> : vector<8x256xf32>
    %147 = tpu.matmul %142, %9, %cst_53 {dimension_numbers = #tpu.dot_dimension_numbers<[1], [0], [0], [1], [0, 0, 1, 1], [], []>} : vector<8x64xf32>, vector<64x256xf32>, vector<8x256xf32> -> vector<8x256xf32>
    %148 = arith.addf %146, %147 : vector<8x256xf32>
    %149 = vector.extract_strided_slice %148 {offsets = [0, 0], sizes = [8, 128], strides = [1, 1]} : vector<8x256xf32> to vector<8x128xf32>
    %cst_54 = arith.constant 5.000000e-01 : f32
    %150 = vector.broadcast %cst_54 : f32 to vector<8x128xf32>
    %151 = arith.mulf %150, %149 : vector<8x128xf32>
    %152 = math.tanh %151 : vector<8x128xf32>
    %cst_55 = arith.constant 1.000000e+00 : f32
    %153 = vector.broadcast %cst_55 : f32 to vector<8x128xf32>
    %154 = arith.addf %152, %153 : vector<8x128xf32>
    %cst_56 = arith.constant 5.000000e-01 : f32
    %155 = vector.broadcast %cst_56 : f32 to vector<8x128xf32>
    %156 = arith.mulf %155, %154 : vector<8x128xf32>
    %157 = vector.extract_strided_slice %148 {offsets = [0, 128], sizes = [8, 64], strides = [1, 1]} : vector<8x256xf32> to vector<8x64xf32>
    %158 = math.tanh %157 : vector<8x64xf32>
    %159 = vector.extract_strided_slice %156 {offsets = [0, 64], sizes = [8, 64], strides = [1, 1]} : vector<8x128xf32> to vector<8x64xf32>
    %160 = arith.mulf %159, %132 : vector<8x64xf32>
    %161 = vector.extract_strided_slice %156 {offsets = [0, 0], sizes = [8, 64], strides = [1, 1]} : vector<8x128xf32> to vector<8x64xf32>
    %162 = arith.mulf %161, %158 : vector<8x64xf32>
    %163 = arith.addf %160, %162 : vector<8x64xf32>
    %164 = vector.extract_strided_slice %148 {offsets = [0, 192], sizes = [8, 64], strides = [1, 1]} : vector<8x256xf32> to vector<8x64xf32>
    %cst_57 = arith.constant 5.000000e-01 : f32
    %165 = vector.broadcast %cst_57 : f32 to vector<8x64xf32>
    %166 = arith.mulf %165, %164 : vector<8x64xf32>
    %167 = math.tanh %166 : vector<8x64xf32>
    %cst_58 = arith.constant 1.000000e+00 : f32
    %168 = vector.broadcast %cst_58 : f32 to vector<8x64xf32>
    %169 = arith.addf %167, %168 : vector<8x64xf32>
    %cst_59 = arith.constant 5.000000e-01 : f32
    %170 = vector.broadcast %cst_59 : f32 to vector<8x64xf32>
    %171 = arith.mulf %170, %169 : vector<8x64xf32>
    %172 = math.tanh %163 : vector<8x64xf32>
    %173 = arith.mulf %171, %172 : vector<8x64xf32>
    %c5_i32 = arith.constant 5 : i32
    %c8_i32_60 = arith.constant 8 : i32
    %174 = arith.muli %c5_i32, %c8_i32_60 : i32
    %175 = tpu.assume_multiple %174, 8 : i32
    %176 = arith.index_cast %175 : i32 to index
    %c0_61 = arith.constant 0 : index
    %177 = vector.load %arg6[%176, %c0_61] : memref<56x256xf32, #tpu.memory_space<vmem>>, vector<8x256xf32>
    %cst_62 = arith.constant dense<0.000000e+00> : vector<8x256xf32>
    %178 = tpu.matmul %173, %9, %cst_62 {dimension_numbers = #tpu.dot_dimension_numbers<[1], [0], [0], [1], [0, 0, 1, 1], [], []>} : vector<8x64xf32>, vector<64x256xf32>, vector<8x256xf32> -> vector<8x256xf32>
    %179 = arith.addf %177, %178 : vector<8x256xf32>
    %180 = vector.extract_strided_slice %179 {offsets = [0, 0], sizes = [8, 128], strides = [1, 1]} : vector<8x256xf32> to vector<8x128xf32>
    %cst_63 = arith.constant 5.000000e-01 : f32
    %181 = vector.broadcast %cst_63 : f32 to vector<8x128xf32>
    %182 = arith.mulf %181, %180 : vector<8x128xf32>
    %183 = math.tanh %182 : vector<8x128xf32>
    %cst_64 = arith.constant 1.000000e+00 : f32
    %184 = vector.broadcast %cst_64 : f32 to vector<8x128xf32>
    %185 = arith.addf %183, %184 : vector<8x128xf32>
    %cst_65 = arith.constant 5.000000e-01 : f32
    %186 = vector.broadcast %cst_65 : f32 to vector<8x128xf32>
    %187 = arith.mulf %186, %185 : vector<8x128xf32>
    %188 = vector.extract_strided_slice %179 {offsets = [0, 128], sizes = [8, 64], strides = [1, 1]} : vector<8x256xf32> to vector<8x64xf32>
    %189 = math.tanh %188 : vector<8x64xf32>
    %190 = vector.extract_strided_slice %187 {offsets = [0, 64], sizes = [8, 64], strides = [1, 1]} : vector<8x128xf32> to vector<8x64xf32>
    %191 = arith.mulf %190, %163 : vector<8x64xf32>
    %192 = vector.extract_strided_slice %187 {offsets = [0, 0], sizes = [8, 64], strides = [1, 1]} : vector<8x128xf32> to vector<8x64xf32>
    %193 = arith.mulf %192, %189 : vector<8x64xf32>
    %194 = arith.addf %191, %193 : vector<8x64xf32>
    %195 = vector.extract_strided_slice %179 {offsets = [0, 192], sizes = [8, 64], strides = [1, 1]} : vector<8x256xf32> to vector<8x64xf32>
    %cst_66 = arith.constant 5.000000e-01 : f32
    %196 = vector.broadcast %cst_66 : f32 to vector<8x64xf32>
    %197 = arith.mulf %196, %195 : vector<8x64xf32>
    %198 = math.tanh %197 : vector<8x64xf32>
    %cst_67 = arith.constant 1.000000e+00 : f32
    %199 = vector.broadcast %cst_67 : f32 to vector<8x64xf32>
    %200 = arith.addf %198, %199 : vector<8x64xf32>
    %cst_68 = arith.constant 5.000000e-01 : f32
    %201 = vector.broadcast %cst_68 : f32 to vector<8x64xf32>
    %202 = arith.mulf %201, %200 : vector<8x64xf32>
    %203 = math.tanh %194 : vector<8x64xf32>
    %204 = arith.mulf %202, %203 : vector<8x64xf32>
    %c6_i32 = arith.constant 6 : i32
    %c8_i32_69 = arith.constant 8 : i32
    %205 = arith.muli %c6_i32, %c8_i32_69 : i32
    %206 = tpu.assume_multiple %205, 8 : i32
    %207 = arith.index_cast %206 : i32 to index
    %c0_70 = arith.constant 0 : index
    %208 = vector.load %arg6[%207, %c0_70] : memref<56x256xf32, #tpu.memory_space<vmem>>, vector<8x256xf32>
    %cst_71 = arith.constant dense<0.000000e+00> : vector<8x256xf32>
    %209 = tpu.matmul %204, %9, %cst_71 {dimension_numbers = #tpu.dot_dimension_numbers<[1], [0], [0], [1], [0, 0, 1, 1], [], []>} : vector<8x64xf32>, vector<64x256xf32>, vector<8x256xf32> -> vector<8x256xf32>
    %210 = arith.addf %208, %209 : vector<8x256xf32>
    %211 = vector.extract_strided_slice %210 {offsets = [0, 0], sizes = [8, 128], strides = [1, 1]} : vector<8x256xf32> to vector<8x128xf32>
    %cst_72 = arith.constant 5.000000e-01 : f32
    %212 = vector.broadcast %cst_72 : f32 to vector<8x128xf32>
    %213 = arith.mulf %212, %211 : vector<8x128xf32>
    %214 = math.tanh %213 : vector<8x128xf32>
    %cst_73 = arith.constant 1.000000e+00 : f32
    %215 = vector.broadcast %cst_73 : f32 to vector<8x128xf32>
    %216 = arith.addf %214, %215 : vector<8x128xf32>
    %cst_74 = arith.constant 5.000000e-01 : f32
    %217 = vector.broadcast %cst_74 : f32 to vector<8x128xf32>
    %218 = arith.mulf %217, %216 : vector<8x128xf32>
    %219 = vector.extract_strided_slice %210 {offsets = [0, 128], sizes = [8, 64], strides = [1, 1]} : vector<8x256xf32> to vector<8x64xf32>
    %220 = math.tanh %219 : vector<8x64xf32>
    %221 = vector.extract_strided_slice %218 {offsets = [0, 64], sizes = [8, 64], strides = [1, 1]} : vector<8x128xf32> to vector<8x64xf32>
    %222 = arith.mulf %221, %194 : vector<8x64xf32>
    %223 = vector.extract_strided_slice %218 {offsets = [0, 0], sizes = [8, 64], strides = [1, 1]} : vector<8x128xf32> to vector<8x64xf32>
    %224 = arith.mulf %223, %220 : vector<8x64xf32>
    %225 = arith.addf %222, %224 : vector<8x64xf32>
    %226 = vector.extract_strided_slice %210 {offsets = [0, 192], sizes = [8, 64], strides = [1, 1]} : vector<8x256xf32> to vector<8x64xf32>
    %cst_75 = arith.constant 5.000000e-01 : f32
    %227 = vector.broadcast %cst_75 : f32 to vector<8x64xf32>
    %228 = arith.mulf %227, %226 : vector<8x64xf32>
    %229 = math.tanh %228 : vector<8x64xf32>
    %cst_76 = arith.constant 1.000000e+00 : f32
    %230 = vector.broadcast %cst_76 : f32 to vector<8x64xf32>
    %231 = arith.addf %229, %230 : vector<8x64xf32>
    %cst_77 = arith.constant 5.000000e-01 : f32
    %232 = vector.broadcast %cst_77 : f32 to vector<8x64xf32>
    %233 = arith.mulf %232, %231 : vector<8x64xf32>
    %234 = math.tanh %225 : vector<8x64xf32>
    %235 = arith.mulf %233, %234 : vector<8x64xf32>
    %c7_i32 = arith.constant 7 : i32
    %236 = vector.extract_strided_slice %7 {offsets = [48, 0], sizes = [8, 64], strides = [1, 1]} : vector<56x64xf32> to vector<8x64xf32>
    %cst_78 = arith.constant dense<0.000000e+00> : vector<8x256xf32>
    %237 = tpu.matmul %236, %10, %cst_78 {dimension_numbers = #tpu.dot_dimension_numbers<[1], [0], [0], [1], [0, 0, 1, 1], [], []>} : vector<8x64xf32>, vector<64x256xf32>, vector<8x256xf32> -> vector<8x256xf32>
    %238 = vector.broadcast %12 : vector<1x256xf32> to vector<8x256xf32>
    %239 = arith.addf %237, %238 : vector<8x256xf32>
    %240 = vector.extract_strided_slice %239 {offsets = [0, 0], sizes = [8, 64], strides = [1, 1]} : vector<8x256xf32> to vector<8x64xf32>
    %cst_79 = arith.constant 5.000000e-01 : f32
    %241 = vector.broadcast %cst_79 : f32 to vector<8x64xf32>
    %242 = arith.mulf %241, %240 : vector<8x64xf32>
    %243 = math.tanh %242 : vector<8x64xf32>
    %cst_80 = arith.constant 1.000000e+00 : f32
    %244 = vector.broadcast %cst_80 : f32 to vector<8x64xf32>
    %245 = arith.addf %243, %244 : vector<8x64xf32>
    %cst_81 = arith.constant 5.000000e-01 : f32
    %246 = vector.broadcast %cst_81 : f32 to vector<8x64xf32>
    %247 = arith.mulf %246, %245 : vector<8x64xf32>
    %248 = vector.extract_strided_slice %239 {offsets = [0, 128], sizes = [8, 64], strides = [1, 1]} : vector<8x256xf32> to vector<8x64xf32>
    %249 = math.tanh %248 : vector<8x64xf32>
    %250 = vector.extract_strided_slice %239 {offsets = [0, 192], sizes = [8, 64], strides = [1, 1]} : vector<8x256xf32> to vector<8x64xf32>
    %cst_82 = arith.constant 5.000000e-01 : f32
    %251 = vector.broadcast %cst_82 : f32 to vector<8x64xf32>
    %252 = arith.mulf %251, %250 : vector<8x64xf32>
    %253 = math.tanh %252 : vector<8x64xf32>
    %cst_83 = arith.constant 1.000000e+00 : f32
    %254 = vector.broadcast %cst_83 : f32 to vector<8x64xf32>
    %255 = arith.addf %253, %254 : vector<8x64xf32>
    %cst_84 = arith.constant 5.000000e-01 : f32
    %256 = vector.broadcast %cst_84 : f32 to vector<8x64xf32>
    %257 = arith.mulf %256, %255 : vector<8x64xf32>
    %258 = arith.mulf %247, %249 : vector<8x64xf32>
    %259 = math.tanh %258 : vector<8x64xf32>
    %260 = arith.mulf %257, %259 : vector<8x64xf32>
    %c0_85 = arith.constant 0 : index
    %c0_86 = arith.constant 0 : index
    %261 = vector.load %arg4[%c0_85, %c0_86] : memref<129x128xf32, #tpu.memory_space<vmem>>, vector<64x128xf32>
    %cst_87 = arith.constant dense<0.000000e+00> : vector<8x128xf32>
    %262 = tpu.matmul %235, %261, %cst_87 {dimension_numbers = #tpu.dot_dimension_numbers<[1], [0], [0], [1], [0, 0, 1, 1], [], []>} : vector<8x64xf32>, vector<64x128xf32>, vector<8x128xf32> -> vector<8x128xf32>
    %c64_88 = arith.constant 64 : index
    %c0_89 = arith.constant 0 : index
    %263 = vector.load %arg4[%c64_88, %c0_89] : memref<129x128xf32, #tpu.memory_space<vmem>>, vector<64x128xf32>
    %cst_90 = arith.constant dense<0.000000e+00> : vector<8x128xf32>
    %264 = tpu.matmul %260, %263, %cst_90 {dimension_numbers = #tpu.dot_dimension_numbers<[1], [0], [0], [1], [0, 0, 1, 1], [], []>} : vector<8x64xf32>, vector<64x128xf32>, vector<8x128xf32> -> vector<8x128xf32>
    %265 = arith.addf %262, %264 : vector<8x128xf32>
    %c128_91 = arith.constant 128 : index
    %c0_92 = arith.constant 0 : index
    %266 = vector.load %arg4[%c128_91, %c0_92] : memref<129x128xf32, #tpu.memory_space<vmem>>, vector<1x128xf32>
    %267 = vector.broadcast %266 : vector<1x128xf32> to vector<8x128xf32>
    %268 = arith.addf %265, %267 : vector<8x128xf32>
    %c0_93 = arith.constant 0 : index
    %c0_94 = arith.constant 0 : index
    %269 = vector.load %arg5[%c0_93, %c0_94] : memref<8x128xf32, #tpu.memory_space<vmem>>, vector<8x128xf32>
    tpu.vector_store %arg5[%c0_93, %c0_94], %268 {strides = array<i32>} : memref<8x128xf32, #tpu.memory_space<vmem>>, vector<8x128xf32>,
    return
  }
}

</mosaic_0001>

<bundles_post_ra>
// kernel: cnn_bilstm_forward.1
= control target key start
LH: loop header
LB: loop body
LE: loop exit
PB: predicated region body
PF: predicated region fallthrough
CT: control target
= control target key end

     0   :  { %vm78_vm0 = vcmask 1043456   ;;  %vm35_vm1 = vcmask 31744   ;;  %v1623_v47 = vmov 0.0   ;;  %vm300_vm2 = vcmask 523264   ;;  %s1624_s8 = smov 64   ;;  %s2204_s1 = inlined_call_operand.vmem [shape: f32[4,64], index: 1, kind: input, shape index: {}]   ;;  %s2205_s0 = inlined_call_operand.vmem [shape: f32[112,4], index: 0, kind: input, shape index: {}]   ;;  %s2206_s2 = inlined_call_operand.vmem [shape: f32[192,256], index: 2, kind: input, shape index: {}]   ;;  %s2207_s3 = inlined_call_operand.vmem [shape: f32[2,256], index: 3, kind: input, shape index: {}]   ;;  %s2208_s4 = inlined_call_operand.vmem [shape: f32[129,128], index: 4, kind: input, shape index: {}]   ;;  %s2209_s5 = inlined_call_operand.vmem [shape: f32[8,128], index: 5, kind: output, shape index: {}]  }
   0x1   :  { %v34_v0 = vld [vmem:[%s2204_s1] sm:$0xf]  ;;  %v21_v2 = vld [vmem:[%s2205_s0 + $0x8] sm:$0xff]  ;;  %v22_v3 = vld [vmem:[%s2205_s0 + $0x10] sm:$0xff]  ;;  %386 = vmatprep.mubr.f32.mxu1 %v1623_v47  ;;  %vm1625_vm3 = vmmov 0  }
   0x2   :  { %v20_v1 = vld [vmem:[%s2205_s0] sm:$0xff]  ;;  %1495 = vmatprep.subr.msk.mxu0 %vm78_vm0, %v34_v0  ;;  %v23_v4 = vld [vmem:[%s2205_s0 + $0x18] sm:$0xff]  ;;  %v1685_v7 = vld [vmem:[%s2206_s2 + $0xf0] sm:$0xff] }
   0x3   :  { %1497 = vmatprep.mubr.msk.f32.mxu0 %vm35_vm1, %v20_v1  ;;  %1496 = vmatpush3.msk.msra.mxu0 %vm78_vm0, %v34_v0  ;;  %v24_v5 = vld [vmem:[%s2205_s0 + $0x20] sm:$0xff]  ;;  %v1680_v6 = vld [vmem:[%s2206_s2 + $0xf8] sm:$0xff]  ;;  %v1691_v8 = vld [vmem:[%s2206_s2 + $0xe8] sm:$0xff] }
   0x4   :  { %1498 = vmatmul.mubr.msk.f32.vlgmr.msra.gmra.mxu0 %vm35_vm1, %v21_v2  ;;  %467 = vmatprep.subr.mxu0 %v1680_v6  ;;  %v1697_v9 = vld [vmem:[%s2206_s2 + $0xe0] sm:$0xff]  ;;  %v25_v10 = vld [vmem:[%s2205_s0 + $0x28] sm:$0xff]  ;;  %v1707_v11 = vld [vmem:[%s2206_s2 + $0xd8] sm:$0xff] }
   0x5   :  { %1500 = vmatprep.mubr.msk.f32.mxu0 %vm35_vm1, %v22_v3  ;;  %468 = vmatpush1.msra.mxu0 %v1685_v7  ;;  %v26_v12 = vld [vmem:[%s2205_s0 + $0x30] sm:$0xff]  ;;  %v27_v14 = vld [vmem:[%s2205_s0 + $0x38] sm:$0xff]  ;;  %v28_v15 = vld [vmem:[%s2205_s0 + $0x40] sm:$0xff] }
   0x6   :  { %469 = vmatprep.subr.mxu0 %v1691_v8  ;;  %v1716_v13 = vld [vmem:[%s2206_s2 + $0xd0] sm:$0xff]  ;;  %v29_v16 = vld [vmem:[%s2205_s0 + $0x48] sm:$0xff]  ;;  %v31_v18 = vld [vmem:[%s2205_s0 + $0x58] sm:$0xff] }
   0x7   :  { %470 = vmatpush1.msra.mxu0 %v1697_v9  ;;  %v30_v17 = vld [vmem:[%s2205_s0 + $0x50] sm:$0xff]  ;;  %v32_v19 = vld [vmem:[%s2205_s0 + $0x60] sm:$0xff]  ;;  %v33_v20 = vld [vmem:[%s2205_s0 + $0x68] sm:$0xff] }
   0x8   :  { %1501 = vmatmul.mubr.msk.f32.gmra.mxu0 %vm35_vm1, %v23_v4  ;;  %471 = vmatprep.subr.mxu0 %v1707_v11  ;;  %v253_v21 = vld [vmem:[%s2206_s2 + $0x78] sm:$0xff]  ;;  %v1757_v22 = vld [vmem:[%s2206_s2 + $0xc8] sm:$0xff]  ;;  %v252_v23 = vld [vmem:[%s2206_s2 + $0x70] sm:$0xff] }
   0x9   :  { %1503 = vmatprep.mubr.msk.f32.mxu0 %vm35_vm1, %v24_v5  ;;  %472 = vmatpush1.msra.mxu0 %v1716_v13  ;;  %v251_v24 = vld [vmem:[%s2206_s2 + $0x68] sm:$0xff]  ;;  %v1769_v25 = vld [vmem:[%s2206_s2 + $0xc0] sm:$0xff]  ;;  %v249_v27 = vld [vmem:[%s2206_s2 + $0x58] sm:$0xff] }
   0xa   :  { %338 = vmatprep.subr.mxu1 %v253_v21  ;;  %473 = vmatprep.subr.mxu0 %v1757_v22  ;;  %v250_v26 = vld [vmem:[%s2206_s2 + $0x60] sm:$0xff]  ;;  %v1781_v28 = vld [vmem:[%s2206_s2 + $0xb8] sm:$0xff]  ;;  %v1786_v29 = vld [vmem:[%s2206_s2 + $0xb0] sm:$0xff] }
   0xb   :  { %339 = vmatpush1.msra.mxu1 %v252_v23  ;;  %474 = vmatpush1.msra.mxu0 %v1769_v25  ;;  %v248_v30 = vld [vmem:[%s2206_s2 + $0x50] sm:$0xff]  ;;  %v247_v31 = vld [vmem:[%s2206_s2 + $0x48] sm:$0xff]  ;;  %v246_v32 = vld [vmem:[%s2206_s2 + $0x40] sm:$0xff] }
   0xc   :  { %1504 = vmatmul.mubr.msk.f32.gmra.mxu0 %vm35_vm1, %v25_v10  ;;  %340 = vmatprep.subr.mxu1 %v251_v24  ;;  %v245_v33 = vld [vmem:[%s2206_s2 + $0x38] sm:$0xff]  ;;  %v1805_v34 = vld [vmem:[%s2206_s2 + $0xa8] sm:$0xff]  ;;  %v1810_v35 = vld [vmem:[%s2206_s2 + $0xa0] sm:$0xff] }
   0xd   :  { %1506 = vmatprep.mubr.msk.f32.mxu0 %vm35_vm1, %v26_v12  ;;  %341 = vmatpush1.msra.mxu1 %v250_v26  ;;  %v244_v36 = vld [vmem:[%s2206_s2 + $0x30] sm:$0xff]  ;;  %v243_v37 = vld [vmem:[%s2206_s2 + $0x28] sm:$0xff]  ;;  %v1823_v38 = vld [vmem:[%s2206_s2 + $0x98] sm:$0xff] }
   0xe   :  { %342 = vmatprep.subr.mxu1 %v249_v27  ;;  %475 = vmatprep.subr.mxu0 %v1781_v28  ;;  %v242_v39 = vld [vmem:[%s2206_s2 + $0x20] sm:$0xff]  ;;  %v241_v40 = vld [vmem:[%s2206_s2 + $0x18] sm:$0xff]  ;;  %v1835_v41 = vld [vmem:[%s2206_s2 + $0x90] sm:$0xff]  ;;  %v290_v27 = vlaneseq }
   0xf   :  { %343 = vmatpush1.msra.mxu1 %v248_v30  ;;  %476 = vmatpush1.msra.mxu0 %v1786_v29  ;;  %v240_v42 = vld [vmem:[%s2206_s2 + $0x10] sm:$0xff]  ;;  %v239_v43 = vld [vmem:[%s2206_s2 + $0x8] sm:$0xff]  ;;  %v238_v45 = vld [vmem:[%s2206_s2] sm:$0xff] }
  0x10   :  { %1507 = vmatmul.mubr.msk.f32.gmra.mxu0 %vm35_vm1, %v27_v14  ;;  %344 = vmatprep.subr.mxu1 %v247_v31  ;;  %v1847_v44 = vld [vmem:[%s2206_s2 + $0x88] sm:$0xff]  ;;  %v1856_v46 = vld [vmem:[%s2206_s2 + $0x80] sm:$0xff]  ;;  %v1914_v30 = vshrl.u32 %v290_v27, 7 }
  0x11   :  { %1509 = vmatprep.mubr.msk.f32.mxu0 %vm35_vm1, %v28_v15  ;;  %345 = vmatpush1.msra.mxu1 %v246_v32  ;;  %v286_v32 = vld [vmem:[%s2207_s3] ss:$2 sm:$0x3] }
  0x12   :  { %346 = vmatprep.subr.mxu1 %v245_v33  ;;  %477 = vmatprep.subr.mxu0 %v1805_v34  ;;  %v292_v31 = vsub.s32 0, %v1914_v30  ;;  %v296_v33 = vsub.s32 1, %v1914_v30 }
  0x13   :  { %347 = vmatpush1.msra.mxu1 %v244_v36  ;;  %478 = vmatpush1.msra.mxu0 %v1810_v35 }
  0x14   :  { %1510 = vmatmul.mubr.msk.f32.gmra.mxu0 %vm35_vm1, %v29_v16  ;;  %348 = vmatprep.subr.mxu1 %v243_v37  ;;  %v1923_v36 = vrot.slane %v286_v32, %v292_v31  ;;  %v1927_v37 = vrot.slane %v286_v32, %v296_v33 }
  0x15   :  { %1512 = vmatprep.mubr.msk.f32.mxu0 %vm35_vm1, %v30_v17  ;;  %479 = vmatprep.subr.mxu0 %v1823_v38 }
  0x16   :  { %349 = vmatpush1.msra.mxu1 %v242_v39  ;;  %480 = vmatpush1.msra.mxu0 %v1835_v41 }
  0x17   :  { %350 = vmatprep.subr.mxu1 %v241_v40  ;;  %481 = vmatprep.subr.mxu0 %v1847_v44 }
  0x18   :  { %1513 = vmatmul.mubr.msk.f32.gmra.mxu0 %vm35_vm1, %v31_v18  ;;  %351 = vmatpush1.msra.mxu1 %v240_v42 }
  0x19   :  { %1515 = vmatprep.mubr.msk.f32.mxu0 %vm35_vm1, %v32_v19  ;;  %352 = vmatprep.subr.mxu1 %v239_v43 }
  0x1a   :  { %353 = vmatpush1.msra.mxu1 %v238_v45  ;;  %482 = vmatpush1.msra.mxu0 %v1856_v46 }
  0x1b   :  { %568 = vmatprep.subr.mxu1 %v1680_v6  ;;  %669 = vmatprep.subr.mxu0 %v1680_v6 }
  0x1c   :  { %1516 = vmatmul.mubr.msk.f32.gmra.mxu0 %vm35_vm1, %v33_v20 }
  0x1d   :  { %515 = vmatprep.mubr.f32.mxu0 %v1623_v47 }
  0x20   :  { %516 = vmatmul.mubr.f32.vlgmr.msra.gmra.mxu0 %v1623_v47 }
  0x21   :  { %717 = vmatprep.mubr.f32.mxu0 %v1623_v47  ;;  %670 = vmatpush1.msra.mxu0 %v1685_v7 }
  0x22   :  { %671 = vmatprep.subr.mxu0 %v1691_v8 }
  0x23   :  { %672 = vmatpush1.msra.mxu0 %v1697_v9 }
  0x24   :  { %673 = vmatprep.subr.mxu0 %v1707_v11 }
  0x25   :  { %674 = vmatpush1.msra.mxu0 %v1716_v13 }
  0x26   :  { %675 = vmatprep.subr.mxu0 %v1757_v22 }
  0x27   :  { %676 = vmatpush1.msra.mxu0 %v1769_v25 }
  0x28   :  { %677 = vmatprep.subr.mxu0 %v1781_v28 }
  0x29   :  { %678 = vmatpush1.msra.mxu0 %v1786_v29 }
  0x2a   :  { %679 = vmatprep.subr.mxu0 %v1805_v34 }
  0x2b   :  { %680 = vmatpush1.msra.mxu0 %v1810_v35 }
  0x2c   :  { %681 = vmatprep.subr.mxu0 %v1823_v38 }
  0x2d   :  { %682 = vmatpush1.msra.mxu0 %v1835_v41 }
  0x2e   :  { %683 = vmatprep.subr.mxu0 %v1847_v44 }
  0x2f   :  { %684 = vmatpush1.msra.mxu0 %v1856_v46 }
  0x30   :  { %871 = vmatprep.subr.mxu0 %v1680_v6 }
  0xc4   :  { %v1499_v48 = vpop.f32.mrf.mxu0 }
  0xc5   :  { %v218_v61 = vmax.f32 %v1499_v48, 0.0 }
  0xc6   :  { %v148_v49 = vpop.f32.mrf.mxu0 }
  0xc7   :  { %v217_v55 = vmax.f32 %v148_v49, 0.0 }
  0xc8   :  { %v1502_v50 = vpop.f32.mrf.mxu0 }
  0xc9   :  { %v220_v12 = vmax.f32 %v1502_v50, 0.0 }
  0xca   :  { %v158_v51 = vpop.f32.mrf.mxu0 }
  0xcb   :  { %v219_v3 = vmax.f32 %v158_v51, 0.0 }
  0xcc   :  { %v1505_v52 = vpop.f32.mrf.mxu0 }
  0xcd   :  { %v222_v20 = vmax.f32 %v1505_v52, 0.0 }
  0xce   :  { %v168_v53 = vpop.f32.mrf.mxu0 }
  0xcf   :  { %v221_v17 = vmax.f32 %v168_v53, 0.0 }
  0xd0   :  { %v1508_v54 = vpop.f32.mrf.mxu0 }
  0xd1   :  { %v224_v56 = vmax.f32 %v1508_v54, 0.0 }
  0xd2   :  { %v178_v57 = vpop.f32.mrf.mxu0 }
  0xd3   :  { %v231_v58 = vmax.f32 %v217_v55, %v224_v56  ;;  %v223_v24 = vmax.f32 %v178_v57, 0.0 }
  0xd4   :  { %v1511_v59 = vpop.f32.mrf.mxu0 }
  0xd5   :  { %1445 = vmatmul.mubr.msk.f32.vlgmr.msra.gmra.mxu1 %vm300_vm2, %v231_v58  ;;  %v226_v0 = vmax.f32 %v1511_v59, 0.0 }
  0xd6   :  { %v188_v60 = vpop.f32.mrf.mxu0  ;;  %392 = vmatprep.mubr.f32.mxu1 %v1623_v47  ;;  %569 = vmatpush1.msra.mxu1 %v1685_v7 }
  0xd7   :  { %v225_v62 = vmax.f32 %v188_v60, 0.0  ;;  %570 = vmatprep.subr.mxu1 %v1691_v8  ;;  %v233_v4 = vmax.f32 %v219_v3, %v226_v0 }
  0xd8   :  { %v1514_v63 = vpop.f32.mrf.mxu0  ;;  %571 = vmatpush1.msra.mxu1 %v1697_v9 }
  0xd9   :  { %v232_v1 = vmax.f32 %v218_v61, %v225_v62  ;;  %572 = vmatprep.subr.mxu1 %v1707_v11  ;;  %v228_v14 = vmax.f32 %v1514_v63, 0.0 }
  0xda   :  { %v198_v2 = vpop.f32.mrf.mxu0  ;;  %573 = vmatpush1.msra.mxu1 %v1716_v13 }
  0xdb   :  { %1446 = vmatmul.mubr.msk.f32.gmra.mxu1 %vm300_vm2, %v232_v1  ;;  %574 = vmatprep.subr.mxu1 %v1757_v22  ;;  %v227_v5 = vmax.f32 %v198_v2, 0.0  ;;  %v235_v18 = vmax.f32 %v221_v17, %v228_v14 }
  0xdc   :  { %398 = vmatprep.mubr.f32.mxu1 %v1623_v47  ;;  %575 = vmatpush1.msra.mxu1 %v1769_v25  ;;  %v1517_v10 = vpop.f32.mrf.mxu0 }
  0xdd   :  { %576 = vmatprep.subr.mxu1 %v1781_v28  ;;  %v234_v15 = vmax.f32 %v220_v12, %v227_v5  ;;  %v230_v21 = vmax.f32 %v1517_v10, 0.0 }
  0xde   :  { %577 = vmatpush1.msra.mxu1 %v1786_v29  ;;  %v208_v16 = vpop.f32.mrf.mxu0 }
  0xdf   :  { %1447 = vmatmul.mubr.msk.f32.gmra.mxu1 %vm300_vm2, %v233_v4  ;;  %578 = vmatprep.subr.mxu1 %v1805_v34  ;;  %v229_v19 = vmax.f32 %v208_v16, 0.0  ;;  %v1909_v26 = vmax.f32 %v223_v24, %v230_v21 }
  0xe0   :  { %404 = vmatprep.mubr.f32.mxu1 %v1623_v47  ;;  %579 = vmatpush1.msra.mxu1 %v1810_v35  ;;  %v517_v42 = vpop.f32.mrf.mxu0 }
  0xe1   :  { %580 = vmatprep.subr.mxu1 %v1823_v38  ;;  %v236_v23 = vmax.f32 %v222_v20, %v229_v19 }
  0xe2   :  { %581 = vmatpush1.msra.mxu1 %v1835_v41  ;;  %v519_v50 = vpop.f32.mrf.mxu0 }
  0xe3   :  { %1448 = vmatmul.mubr.msk.f32.gmra.mxu1 %vm300_vm2, %v234_v15  ;;  %582 = vmatprep.subr.mxu1 %v1847_v44 }
  0xe4   :  { %410 = vmatprep.mubr.f32.mxu1 %v1623_v47  ;;  %583 = vmatpush1.msra.mxu1 %v1856_v46 }
  0xe5   :  { %770 = vmatprep.subr.mxu1 %v1680_v6 }
  0xe7   :  { %1449 = vmatmul.mubr.msk.f32.gmra.mxu1 %vm300_vm2, %v235_v18 }
  0xe8   :  { %416 = vmatprep.mubr.f32.mxu1 %v1623_v47 }
  0xeb   :  { %1450 = vmatmul.mubr.msk.f32.gmra.mxu1 %vm300_vm2, %v236_v23 }
  0xec   :  { %422 = vmatprep.mubr.f32.mxu1 %v1623_v47 }
  0xef   :  { %1451 = vmatmul.mubr.msk.f32.gmra.mxu1 %vm300_vm2, %v1909_v26 }
  0xf0   :  { %616 = vmatprep.mubr.f32.mxu1 %v1623_v47 }
 0x195   :  { %v388_v39 = vpop.f32.mrf.mxu1 }
 0x196   :  { %v389_v40 = vadd.f32 %v388_v39, %v1923_v36 }
 0x197   :  { %v390_v43 = vpop.f32.mrf.mxu1 }
 0x198   :  { %v522_v45 = vadd.f32 %v517_v42, %v389_v40  ;;  %v391_v48 = vadd.f32 %v390_v43, %v1927_v37 }
 0x19a   :  { %v524_v49 = vmul.f32 0.5, %v522_v45  ;;  %v523_v52 = vadd.f32 %v519_v50, %v391_v48 }
 0x19b   :  { %v394_v51 = vpop.f32.mrf.mxu1 }
 0x19c   :  { %1559 = vtanh.f32 %v524_v49  ;;  %v536_v19 = vmul.f32 0.5, %v523_v52  ;;  %v395_v45 = vadd.f32 %v394_v51, %v1923_v36 }
 0x19d   :  { %v1931_v53 = vpop.f32.mrf.mxu1  ;;  %1561 = vtanh.f32 %v523_v52 }
 0x19e   :  { %1563 = vtanh.f32 %v536_v19  ;;  %v397_v52 = vadd.f32 %v1931_v53, %v1927_v37 }
 0x19f   :  { %v400_v54 = vpop.f32.mrf.mxu1 }
 0x1a0   :  { %v1934_v55 = vadd.f32 %v400_v54, %v1923_v36 }
 0x1a1   :  { %v402_v56 = vpop.f32.mrf.mxu1 }
 0x1a2   :  { %v1937_v57 = vadd.f32 %v402_v56, %v1927_v37 }
 0x1a3   :  { %v406_v58 = vpop.f32.mrf.mxu1 }
 0x1a4   :  { %v1940_v59 = vadd.f32 %v406_v58, %v1923_v36 }
 0x1a5   :  { %v408_v60 = vpop.f32.mrf.mxu1 }
 0x1a6   :  { %v1943_v61 = vadd.f32 %v408_v60, %v1927_v37 }
 0x1a7   :  { %v412_v62 = vpop.f32.mrf.mxu1 }
 0x1a8   :  { %v1946_v63 = vadd.f32 %v412_v62, %v1923_v36 }
 0x1a9   :  { %v1560_v0 = vpop.eup %1559  ;;  %v414_v1 = vpop.f32.mrf.mxu1 }
 0x1aa   :  { %v1949_v2 = vadd.f32 %v414_v1, %v1927_v37  ;;  %v526_v3 = vadd.f32 1.0, %v1560_v0  ;;  %v1562_v12 = vpop.eup %1561 }
 0x1ab   :  { %v418_v4 = vpop.f32.mrf.mxu1  ;;  %v1564_v24 = vpop.eup %1563 }
 0x1ac   :  { %v1952_v5 = vadd.f32 %v418_v4, %v1923_v36  ;;  %v527_v10 = vmul.f32 0.5, %v526_v3  ;;  %v538_v27 = vadd.f32 1.0, %v1564_v24 }
 0x1ad   :  { %v420_v14 = vpop.f32.mrf.mxu1 }
 0x1ae   :  { %v1955_v15 = vadd.f32 %v420_v14, %v1927_v37  ;;  %v530_v16 = vmul.f32 %v1562_v12, %v527_v10  ;;  %v529_v20 = vmul.f32 0.0, %v527_v10  ;;  %v539_v32 = vmul.f32 0.5, %v538_v27 }
 0x1af   :  { %v424_v17 = vpop.f32.mrf.mxu1 }
 0x1b0   :  { %v1958_v18 = vadd.f32 %v424_v17, %v1923_v36  ;;  %532 = vrot.lane.b32.xlu0 %v530_v16, %s1624_s8 }
 0x1b1   :  { %v1980_v43 = vpop.f32.mrf.mxu1 }
 0x222   :  { %v533_v21 = vpop.permute.xlu0 %532 }
 0x223   :  { %v535_v23 = vadd.f32 %v533_v21, %v529_v20 }
 0x225   :  { %1565 = vtanh.f32 %v535_v23 }
 0x232   :  { %v1566_v39 = vpop.eup %1565 }
 0x233   :  { %v541_v40 = vmul.f32 %v1566_v39, %v539_v32 }
 0x235   :  { %548 = vrot.lane.b32.xlu0 %v541_v40, %s1624_s8 }
 0x2a7   :  { %v549_v42 = vpop.permute.xlu0 %548 }
 0x2a8   :  { %1452 = vmatmul.mubr.msk.f32.vlgmr.msra.gmra.mxu1 %vm300_vm2, %v549_v42 }
 0x2a9   :  { %771 = vmatpush1.msra.mxu1 %v1685_v7  ;;  %818 = vmatprep.mubr.f32.mxu1 %v1623_v47 }
 0x2aa   :  { %772 = vmatprep.subr.mxu1 %v1691_v8 }
 0x2ab   :  { %773 = vmatpush1.msra.mxu1 %v1697_v9 }
 0x2ac   :  { %774 = vmatprep.subr.mxu1 %v1707_v11 }
 0x2ad   :  { %775 = vmatpush1.msra.mxu1 %v1716_v13 }
 0x2ae   :  { %776 = vmatprep.subr.mxu1 %v1757_v22 }
 0x2af   :  { %777 = vmatpush1.msra.mxu1 %v1769_v25 }
 0x2b0   :  { %778 = vmatprep.subr.mxu1 %v1781_v28 }
 0x2b1   :  { %779 = vmatpush1.msra.mxu1 %v1786_v29 }
 0x2b2   :  { %780 = vmatprep.subr.mxu1 %v1805_v34 }
 0x2b3   :  { %781 = vmatpush1.msra.mxu1 %v1810_v35 }
 0x2b4   :  { %782 = vmatprep.subr.mxu1 %v1823_v38 }
 0x2b5   :  { %783 = vmatpush1.msra.mxu1 %v1835_v41 }
 0x2b6   :  { %784 = vmatprep.subr.mxu1 %v1847_v44 }
 0x2b7   :  { %785 = vmatpush1.msra.mxu1 %v1856_v46 }
 0x2b8   :  { %972 = vmatprep.subr.mxu1 %v1680_v6 }
 0x368   :  { %v618_v48 = vpop.f32.mrf.mxu1 }
 0x369   :  { %v623_v49 = vadd.f32 %v618_v48, %v395_v45 }
 0x36a   :  { %v620_v50 = vpop.f32.mrf.mxu1 }
 0x36b   :  { %v625_v54 = vmul.f32 0.5, %v623_v49  ;;  %v624_v56 = vadd.f32 %v620_v50, %v397_v52 }
 0x36d   :  { %1567 = vtanh.f32 %v625_v54  ;;  %v637_v3 = vmul.f32 0.5, %v624_v56 }
 0x36e   :  { %1569 = vtanh.f32 %v624_v56 }
 0x36f   :  { %1571 = vtanh.f32 %v637_v3 }
 0x37a   :  { %v1568_v58 = vpop.eup %1567 }
 0x37b   :  { %v627_v60 = vadd.f32 1.0, %v1568_v58  ;;  %v1570_v0 = vpop.eup %1569 }
 0x37c   :  { %v1572_v10 = vpop.eup %1571 }
 0x37d   :  { %v628_v62 = vmul.f32 0.5, %v627_v60  ;;  %v639_v12 = vadd.f32 1.0, %v1572_v10 }
 0x37f   :  { %v631_v1 = vmul.f32 %v1570_v0, %v628_v62  ;;  %v630_v36 = vmul.f32 %v628_v62, %v535_v23  ;;  %v640_v53 = vmul.f32 0.5, %v639_v12 }
 0x381   :  { %633 = vrot.lane.b32.xlu1 %v631_v1, %s1624_s8 }
 0x3f3   :  { %v634_v51 = vpop.permute.xlu1 %633 }
 0x3f4   :  { %v636_v4 = vadd.f32 %v634_v51, %v630_v36 }
 0x3f6   :  { %1573 = vtanh.f32 %v636_v4 }
 0x403   :  { %v1574_v14 = vpop.eup %1573 }
 0x404   :  { %v642_v16 = vmul.f32 %v1574_v14, %v640_v53 }
 0x406   :  { %649 = vrot.lane.b32.xlu1 %v642_v16, %s1624_s8 }
 0x478   :  { %v650_v17 = vpop.permute.xlu1 %649 }
 0x479   :  { %1453 = vmatmul.mubr.msk.f32.vlgmr.msra.gmra.mxu0 %vm300_vm2, %v650_v17 }
 0x47a   :  { %872 = vmatpush1.msra.mxu0 %v1685_v7  ;;  %919 = vmatprep.mubr.f32.mxu0 %v1623_v47 }
 0x47b   :  { %873 = vmatprep.subr.mxu0 %v1691_v8 }
 0x47c   :  { %874 = vmatpush1.msra.mxu0 %v1697_v9 }
 0x47d   :  { %875 = vmatprep.subr.mxu0 %v1707_v11 }
 0x47e   :  { %876 = vmatpush1.msra.mxu0 %v1716_v13 }
 0x47f   :  { %877 = vmatprep.subr.mxu0 %v1757_v22 }
 0x480   :  { %878 = vmatpush1.msra.mxu0 %v1769_v25 }
 0x481   :  { %879 = vmatprep.subr.mxu0 %v1781_v28 }
 0x482   :  { %880 = vmatpush1.msra.mxu0 %v1786_v29 }
 0x483   :  { %881 = vmatprep.subr.mxu0 %v1805_v34 }
 0x484   :  { %882 = vmatpush1.msra.mxu0 %v1810_v35 }
 0x485   :  { %883 = vmatprep.subr.mxu0 %v1823_v38 }
 0x486   :  { %884 = vmatpush1.msra.mxu0 %v1835_v41 }
 0x487   :  { %885 = vmatprep.subr.mxu0 %v1847_v44 }
 0x488   :  { %886 = vmatpush1.msra.mxu0 %v1856_v46 }
 0x489   :  { %1073 = vmatprep.subr.mxu0 %v1680_v6 }
 0x539   :  { %v719_v19 = vpop.f32.mrf.mxu0 }
 0x53a   :  { %v724_v20 = vadd.f32 %v719_v19, %v1934_v55 }
 0x53b   :  { %v721_v21 = vpop.f32.mrf.mxu0 }
 0x53c   :  { %v726_v23 = vmul.f32 0.5, %v724_v20  ;;  %v725_v24 = vadd.f32 %v721_v21, %v1937_v57 }
 0x53e   :  { %1575 = vtanh.f32 %v726_v23  ;;  %v738_v45 = vmul.f32 0.5, %v725_v24 }
 0x53f   :  { %1577 = vtanh.f32 %v725_v24 }
 0x540   :  { %1579 = vtanh.f32 %v738_v45  ;;  %v281_v45 = vld [vmem:[%s2206_s2 + $0x158] sm:$0xff] }
 0x54b   :  { %v1576_v27 = vpop.eup %1575 }
 0x54c   :  { %v728_v32 = vadd.f32 1.0, %v1576_v27  ;;  %v1578_v40 = vpop.eup %1577 }
 0x54d   :  { %v1580_v55 = vpop.eup %1579 }
 0x54e   :  { %v729_v39 = vmul.f32 0.5, %v728_v32  ;;  %v740_v50 = vadd.f32 1.0, %v1580_v55  ;;  %v284_v32 = vld [vmem:[%s2206_s2 + $0x170] sm:$0xff]  ;;  %v277_v55 = vld [vmem:[%s2206_s2 + $0x138] sm:$0xff] }
 0x550   :  { %v732_v42 = vmul.f32 %v1578_v40, %v729_v39  ;;  %v731_v48 = vmul.f32 %v729_v39, %v636_v4  ;;  %v741_v52 = vmul.f32 0.5, %v740_v50  ;;  %v283_v40 = vld [vmem:[%s2206_s2 + $0x168] sm:$0xff]  ;;  %v276_v50 = vld [vmem:[%s2206_s2 + $0x130] sm:$0xff] }
 0x552   :  { %734 = vrot.lane.b32.xlu0 %v732_v42, %s1624_s8  ;;  %v282_v42 = vld [vmem:[%s2206_s2 + $0x160] sm:$0xff] }
 0x5c4   :  { %v735_v6 = vpop.permute.xlu0 %734 }
 0x5c5   :  { %v737_v49 = vadd.f32 %v735_v6, %v731_v48  ;;  %v280_v48 = vld [vmem:[%s2206_s2 + $0x150] sm:$0xff]  ;;  %v279_v6 = vld [vmem:[%s2206_s2 + $0x148] sm:$0xff] }
 0x5c7   :  { %1581 = vtanh.f32 %v737_v49 }
 0x5d4   :  { %v1582_v54 = vpop.eup %1581 }
 0x5d5   :  { %v743_v56 = vmul.f32 %v1582_v54, %v741_v52  ;;  %v275_v52 = vld [vmem:[%s2206_s2 + $0x128] sm:$0xff]  ;;  %v274_v54 = vld [vmem:[%s2206_s2 + $0x120] sm:$0xff] }
 0x5d7   :  { %750 = vrot.lane.b32.xlu1 %v743_v56, %s1624_s8  ;;  %v273_v56 = vld [vmem:[%s2206_s2 + $0x118] sm:$0xff] }
 0x649   :  { %v751_v57 = vpop.permute.xlu1 %750 }
 0x64a   :  { %1454 = vmatmul.mubr.msk.f32.vlgmr.msra.gmra.mxu1 %vm300_vm2, %v751_v57  ;;  %v272_v57 = vld [vmem:[%s2206_s2 + $0x110] sm:$0xff] }
 0x64b   :  { %973 = vmatpush1.msra.mxu1 %v1685_v7  ;;  %1020 = vmatprep.mubr.f32.mxu1 %v1623_v47 }
 0x64c   :  { %974 = vmatprep.subr.mxu1 %v1691_v8 }
 0x64d   :  { %975 = vmatpush1.msra.mxu1 %v1697_v9 }
 0x64e   :  { %976 = vmatprep.subr.mxu1 %v1707_v11 }
 0x64f   :  { %977 = vmatpush1.msra.mxu1 %v1716_v13 }
 0x650   :  { %978 = vmatprep.subr.mxu1 %v1757_v22 }
 0x651   :  { %979 = vmatpush1.msra.mxu1 %v1769_v25 }
 0x652   :  { %980 = vmatprep.subr.mxu1 %v1781_v28 }
 0x653   :  { %981 = vmatpush1.msra.mxu1 %v1786_v29 }
 0x654   :  { %982 = vmatprep.subr.mxu1 %v1805_v34 }
 0x655   :  { %983 = vmatpush1.msra.mxu1 %v1810_v35 }
 0x656   :  { %984 = vmatprep.subr.mxu1 %v1823_v38 }
 0x657   :  { %985 = vmatpush1.msra.mxu1 %v1835_v41 }
 0x658   :  { %986 = vmatprep.subr.mxu1 %v1847_v44 }
 0x659   :  { %987 = vmatpush1.msra.mxu1 %v1856_v46 }
 0x70a   :  { %v820_v58 = vpop.f32.mrf.mxu1 }
 0x70b   :  { %v825_v60 = vadd.f32 %v820_v58, %v1940_v59  ;;  %v271_v58 = vld [vmem:[%s2206_s2 + $0x108] sm:$0xff] }
 0x70c   :  { %v822_v62 = vpop.f32.mrf.mxu1 }
 0x70d   :  { %v827_v0 = vmul.f32 0.5, %v825_v60  ;;  %v826_v1 = vadd.f32 %v822_v62, %v1943_v61  ;;  %v270_v60 = vld [vmem:[%s2206_s2 + $0x100] sm:$0xff] }
 0x70f   :  { %1583 = vtanh.f32 %v827_v0  ;;  %v839_v12 = vmul.f32 0.5, %v826_v1 }
 0x710   :  { %1585 = vtanh.f32 %v826_v1 }
 0x711   :  { %1587 = vtanh.f32 %v839_v12 }
 0x71c   :  { %v1584_v3 = vpop.eup %1583 }
 0x71d   :  { %v829_v36 = vadd.f32 1.0, %v1584_v3  ;;  %v1586_v4 = vpop.eup %1585 }
 0x71e   :  { %v1588_v59 = vpop.eup %1587 }
 0x71f   :  { %v830_v51 = vmul.f32 0.5, %v829_v36  ;;  %v841_v17 = vadd.f32 1.0, %v1588_v59 }
 0x721   :  { %v833_v10 = vmul.f32 %v1586_v4, %v830_v51  ;;  %v832_v53 = vmul.f32 %v830_v51, %v737_v49  ;;  %v842_v19 = vmul.f32 0.5, %v841_v17  ;;  %v278_v49 = vld [vmem:[%s2206_s2 + $0x140] sm:$0xff] }
 0x723   :  { %835 = vrot.lane.b32.xlu0 %v833_v10, %s1624_s8 }
 0x795   :  { %v836_v14 = vpop.permute.xlu0 %835 }
 0x796   :  { %v838_v16 = vadd.f32 %v836_v14, %v832_v53 }
 0x798   :  { %1589 = vtanh.f32 %v838_v16 }
 0x7a5   :  { %v1590_v20 = vpop.eup %1589 }
 0x7a6   :  { %v844_v21 = vmul.f32 %v1590_v20, %v842_v19 }
 0x7a8   :  { %851 = vrot.lane.b32.xlu1 %v844_v21, %s1624_s8 }
 0x81a   :  { %v852_v61 = vpop.permute.xlu1 %851 }
 0x81b   :  { %1455 = vmatmul.mubr.msk.f32.vlgmr.msra.gmra.mxu0 %vm300_vm2, %v852_v61 }
 0x81c   :  { %1074 = vmatpush1.msra.mxu0 %v1685_v7  ;;  %1121 = vmatprep.mubr.f32.mxu0 %v1623_v47 }
 0x81d   :  { %1075 = vmatprep.subr.mxu0 %v1691_v8 }
 0x81e   :  { %1076 = vmatpush1.msra.mxu0 %v1697_v9 }
 0x81f   :  { %1077 = vmatprep.subr.mxu0 %v1707_v11 }
 0x820   :  { %1078 = vmatpush1.msra.mxu0 %v1716_v13 }
 0x821   :  { %1079 = vmatprep.subr.mxu0 %v1757_v22 }
 0x822   :  { %1080 = vmatpush1.msra.mxu0 %v1769_v25 }
 0x823   :  { %1081 = vmatprep.subr.mxu0 %v1781_v28 }
 0x824   :  { %1082 = vmatpush1.msra.mxu0 %v1786_v29 }
 0x825   :  { %1083 = vmatprep.subr.mxu0 %v1805_v34 }
 0x826   :  { %1084 = vmatpush1.msra.mxu0 %v1810_v35  ;;  %v285_v35 = vld [vmem:[%s2206_s2 + $0x178] sm:$0xff] }
 0x827   :  { %1085 = vmatprep.subr.mxu0 %v1823_v38  ;;  %1175 = vmatprep.subr.mxu1 %v285_v35  ;;  %v1261_v35 = vld [vmem:[%s2208_s4 + $0x78] sm:$0xff] }
 0x828   :  { %1086 = vmatpush1.msra.mxu0 %v1835_v41 }
 0x829   :  { %1087 = vmatprep.subr.mxu0 %v1847_v44 }
 0x82a   :  { %1088 = vmatpush1.msra.mxu0 %v1856_v46 }
 0x82b   :  { %1518 = vmatprep.subr.mxu0 %v1623_v47 }
 0x8db   :  { %v921_v7 = vpop.f32.mrf.mxu0 }
 0x8dc   :  { %v926_v8 = vadd.f32 %v921_v7, %v1946_v63 }
 0x8dd   :  { %v923_v9 = vpop.f32.mrf.mxu0 }
 0x8de   :  { %v928_v11 = vmul.f32 0.5, %v926_v8  ;;  %v927_v13 = vadd.f32 %v923_v9, %v1949_v2 }
 0x8e0   :  { %1591 = vtanh.f32 %v928_v11  ;;  %v940_v38 = vmul.f32 0.5, %v927_v13 }
 0x8e1   :  { %1593 = vtanh.f32 %v927_v13 }
 0x8e2   :  { %1595 = vtanh.f32 %v940_v38  ;;  %v1260_v38 = vld [vmem:[%s2208_s4 + $0x70] sm:$0xff] }
 0x8ed   :  { %v1592_v22 = vpop.eup %1591 }
 0x8ee   :  { %v930_v25 = vadd.f32 1.0, %v1592_v22  ;;  %v1594_v29 = vpop.eup %1593 }
 0x8ef   :  { %v1596_v63 = vpop.eup %1595 }
 0x8f0   :  { %v931_v28 = vmul.f32 0.5, %v930_v25  ;;  %v942_v2 = vadd.f32 1.0, %v1596_v63  ;;  %v1256_v63 = vld [vmem:[%s2208_s4 + $0x50] sm:$0xff] }
 0x8f2   :  { %v934_v34 = vmul.f32 %v1594_v29, %v931_v28  ;;  %v933_v41 = vmul.f32 %v931_v28, %v838_v16  ;;  %v943_v23 = vmul.f32 0.5, %v942_v2 }
 0x8f4   :  { %936 = vrot.lane.b32.xlu0 %v934_v34, %s1624_s8 }
 0x966   :  { %v937_v44 = vpop.permute.xlu0 %936 }
 0x967   :  { %v2054_v46 = vadd.f32 %v937_v44, %v933_v41  ;;  %v1259_v41 = vld [vmem:[%s2208_s4 + $0x68] sm:$0xff]  ;;  %v1258_v44 = vld [vmem:[%s2208_s4 + $0x60] sm:$0xff] }
 0x969   :  { %1597 = vtanh.f32 %v2054_v46 }
 0x976   :  { %v1598_v24 = vpop.eup %1597 }
 0x977   :  { %v945_v27 = vmul.f32 %v1598_v24, %v943_v23 }
 0x979   :  { %952 = vrot.lane.b32.xlu1 %v945_v27, %s1624_s8 }
 0x9eb   :  { %v953_v39 = vpop.permute.xlu1 %952 }
 0x9ec   :  { %1456 = vmatmul.mubr.msk.f32.vlgmr.msra.gmra.mxu1 %vm300_vm2, %v953_v39 }
 0x9ed   :  { %1176 = vmatpush1.msra.mxu1 %v284_v32  ;;  %1223 = vmatprep.mubr.f32.mxu1 %v1623_v47  ;;  %v427_v32 = vadd.f32 %v1980_v43, %v1927_v37 }
 0x9ee   :  { %1177 = vmatprep.subr.mxu1 %v283_v40 }
 0x9ef   :  { %1178 = vmatpush1.msra.mxu1 %v282_v42  ;;  %v1255_v42 = vld [vmem:[%s2208_s4 + $0x48] sm:$0xff] }
 0x9f0   :  { %1179 = vmatprep.subr.mxu1 %v281_v45  ;;  %v1254_v45 = vld [vmem:[%s2208_s4 + $0x40] sm:$0xff] }
 0x9f1   :  { %1180 = vmatpush1.msra.mxu1 %v280_v48 }
 0x9f2   :  { %1181 = vmatprep.subr.mxu1 %v279_v6 }
 0x9f3   :  { %1182 = vmatpush1.msra.mxu1 %v278_v49 }
 0x9f4   :  { %1183 = vmatprep.subr.mxu1 %v277_v55 }
 0x9f5   :  { %1184 = vmatpush1.msra.mxu1 %v276_v50 }
 0x9f6   :  { %1185 = vmatprep.subr.mxu1 %v275_v52 }
 0x9f7   :  { %1186 = vmatpush1.msra.mxu1 %v274_v54 }
 0x9f8   :  { %1187 = vmatprep.subr.mxu1 %v273_v56  ;;  %v1253_v56 = vld [vmem:[%s2208_s4 + $0x38] sm:$0xff] }
 0x9f9   :  { %1188 = vmatpush1.msra.mxu1 %v272_v57  ;;  %v1252_v57 = vld [vmem:[%s2208_s4 + $0x30] sm:$0xff] }
 0x9fa   :  { %1189 = vmatprep.subr.mxu1 %v271_v58  ;;  %v1251_v58 = vld [vmem:[%s2208_s4 + $0x28] sm:$0xff] }
 0x9fb   :  { %1190 = vmatpush1.msra.mxu1 %v270_v60  ;;  %v1250_v60 = vld [vmem:[%s2208_s4 + $0x20] sm:$0xff] }
 0x9fc   :  { %1458 = vmatmul.mubr.msk.f32.vlgmr.msra.gmra.mxu1 %vm300_vm2, %v1909_v26  ;;  %1537 = vmatprep.subr.mxu1 %v1623_v47  ;;  %v1444_v26 = vld [vmem:[%s2207_s3 + $0x1] ss:$2 sm:$0x3] }
 0x9fd   :  { %1553 = vmatprep.mubr.msk.f32.mxu1 %vm1625_vm3, %v1623_v47  ;;  %1538 = vmatpush3.msra.mxu1 %v1253_v56 }
 0x9fe   :  { %1539 = vmatprep.subr.mxu1 %v1623_v47 }
 0x9ff   :  { %1540 = vmatpush3.msra.mxu1 %v1252_v57 }
 0xa00   :  { %1541 = vmatprep.subr.mxu1 %v1623_v47 }
 0xa01   :  { %1542 = vmatpush3.msra.mxu1 %v1251_v58 }
 0xa02   :  { %1543 = vmatprep.subr.mxu1 %v1623_v47 }
 0xa03   :  { %1544 = vmatpush3.msra.mxu1 %v1250_v60 }
 0xa04   :  { %1545 = vmatprep.subr.mxu1 %v1623_v47 }
 0xaac   :  { %v1022_v62 = vpop.f32.mrf.mxu1 }
 0xaad   :  { %v1027_v0 = vadd.f32 %v1022_v62, %v1952_v5  ;;  %v1152_v5 = vrot.slane %v1444_v26, %v292_v31  ;;  %v1249_v62 = vld [vmem:[%s2208_s4 + $0x18] sm:$0xff] }
 0xaae   :  { %v1024_v1 = vpop.f32.mrf.mxu1  ;;  %1546 = vmatpush3.msra.mxu1 %v1249_v62 }
 0xaaf   :  { %v1029_v3 = vmul.f32 0.5, %v1027_v0  ;;  %v1028_v36 = vadd.f32 %v1024_v1, %v1955_v15  ;;  %v1156_v15 = vrot.slane %v1444_v26, %v296_v33  ;;  %v1248_v0 = vld [vmem:[%s2208_s4 + $0x10] sm:$0xff]  ;;  %1547 = vmatprep.subr.mxu1 %v1623_v47  ;;  %v1247_v1 = vld [vmem:[%s2208_s4 + $0x8] sm:$0xff] }
 0xab0   :  { %1548 = vmatpush3.msra.mxu1 %v1248_v0 }
 0xab1   :  { %1599 = vtanh.f32 %v1029_v3  ;;  %v1041_v20 = vmul.f32 0.5, %v1028_v36  ;;  %1549 = vmatprep.subr.mxu1 %v1623_v47  ;;  %v1246_v3 = vld [vmem:[%s2208_s4] sm:$0xff] }
 0xab2   :  { %1601 = vtanh.f32 %v1028_v36  ;;  %1550 = vmatpush3.msra.mxu1 %v1247_v1 }
 0xab3   :  { %1551 = vmatprep.subr.mxu1 %v1623_v47 }
 0xab4   :  { %1552 = vmatpush3.msra.mxu1 %v1246_v3 }
 0xabc   :  { %v1225_v14 = vpop.f32.mrf.mxu1 }
 0xabd   :  { %v1226_v16 = vadd.f32 %v1225_v14, %v1152_v5 }
 0xabe   :  { %v1600_v51 = vpop.eup %1599  ;;  %v1227_v17 = vpop.f32.mrf.mxu1 }
 0xabf   :  { %v1031_v4 = vadd.f32 1.0, %v1600_v51  ;;  %v1602_v12 = vpop.eup %1601  ;;  %v1230_v59 = vmul.f32 0.5, %v1226_v16  ;;  %v1228_v19 = vadd.f32 %v1227_v17, %v1156_v15 }
 0xac1   :  { %v1032_v10 = vmul.f32 0.5, %v1031_v4  ;;  %1603 = vtanh.f32 %v1230_v59  ;;  %v1235_v2 = vmul.f32 0.5, %v1228_v19 }
 0xac2   :  { %1605 = vtanh.f32 %v1228_v19  ;;  %v1461_v19 = vld [vmem:[%s2208_s4 + $0x80] ss:$0 sm:$0xff] }
 0xac3   :  { %v1035_v53 = vmul.f32 %v1602_v12, %v1032_v10  ;;  %1607 = vtanh.f32 %v1041_v20  ;;  %v1034_v7 = vmul.f32 %v1032_v10, %v2054_v46  ;;  %v1257_v46 = vld [vmem:[%s2208_s4 + $0x58] sm:$0xff] }
 0xac5   :  { %1037 = vrot.lane.b32.xlu0 %v1035_v53, %s1624_s8 }
 0xace   :  { %v1604_v21 = vpop.eup %1603 }
 0xacf   :  { %v1232_v61 = vadd.f32 1.0, %v1604_v21  ;;  %v1606_v31 = vpop.eup %1605 }
 0xad0   :  { %v1608_v22 = vpop.eup %1607 }
 0xad1   :  { %v1233_v9 = vmul.f32 0.5, %v1232_v61  ;;  %v1043_v30 = vadd.f32 1.0, %v1608_v22 }
 0xad3   :  { %v1239_v13 = vmul.f32 %v1606_v31, %v1233_v9  ;;  %v1044_v33 = vmul.f32 0.5, %v1043_v30 }
 0xb37   :  { %v1038_v8 = vpop.permute.xlu0 %1037 }
 0xb38   :  { %v2119_v11 = vadd.f32 %v1038_v8, %v1034_v7 }
 0xb3a   :  { %1609 = vtanh.f32 %v2119_v11 }
 0xb3b   :  { %1611 = vtanh.f32 %v1239_v13 }
 0xb3c   :  { %1613 = vtanh.f32 %v1235_v2 }
 0xb47   :  { %v1610_v25 = vpop.eup %1609 }
 0xb48   :  { %v1046_v28 = vmul.f32 %v1610_v25, %v1044_v33  ;;  %v1612_v29 = vpop.eup %1611 }
 0xb49   :  { %v1614_v37 = vpop.eup %1613 }
 0xb4a   :  { %1053 = vrot.lane.b32.xlu1 %v1046_v28, %s1624_s8  ;;  %v1237_v48 = vadd.f32 1.0, %v1614_v37 }
 0xb4c   :  { %v1238_v52 = vmul.f32 0.5, %v1237_v48 }
 0xb4e   :  { %1242 = vrot.lane.b32.xlu1 %v1612_v29, %s1624_s8 }
 0xbbc   :  { %v1054_v34 = vpop.permute.xlu1 %1053 }
 0xbbd   :  { %1457 = vmatmul.mubr.msk.f32.vlgmr.msra.gmra.mxu0 %vm300_vm2, %v1054_v34 }
 0xbbe   :  { %1519 = vmatpush3.msra.mxu0 %v1261_v35  ;;  %1534 = vmatprep.mubr.msk.f32.mxu0 %vm1625_vm3, %v1623_v47 }
 0xbbf   :  { %1520 = vmatprep.subr.mxu0 %v1623_v47 }
 0xbc0   :  { %1521 = vmatpush3.msra.mxu0 %v1260_v38  ;;  %v1243_v50 = vpop.permute.xlu1 %1242 }
 0xbc1   :  { %1522 = vmatprep.subr.mxu0 %v1623_v47  ;;  %v1245_v54 = vmul.f32 %v1243_v50, %v1238_v52 }
 0xbc2   :  { %1523 = vmatpush3.msra.mxu0 %v1259_v41 }
 0xbc3   :  { %1524 = vmatprep.subr.mxu0 %v1623_v47 }
 0xbc4   :  { %1525 = vmatpush3.msra.mxu0 %v1258_v44 }
 0xbc5   :  { %1526 = vmatprep.subr.mxu0 %v1623_v47 }
 0xbc6   :  { %1527 = vmatpush3.msra.mxu0 %v1257_v46 }
 0xbc7   :  { %1528 = vmatprep.subr.mxu0 %v1623_v47 }
 0xbc8   :  { %1529 = vmatpush3.msra.mxu0 %v1256_v63 }
 0xbc9   :  { %1530 = vmatprep.subr.mxu0 %v1623_v47 }
 0xbca   :  { %1531 = vmatpush3.msra.mxu0 %v1255_v42 }
 0xbcb   :  { %1532 = vmatprep.subr.mxu0 %v1623_v47 }
 0xbcc   :  { %1533 = vmatpush3.msra.mxu0 %v1254_v45 }
 0xc7d   :  { %v1123_v23 = vpop.f32.mrf.mxu0 }
 0xc7e   :  { %v1128_v24 = vadd.f32 %v1123_v23, %v1958_v18 }
 0xc7f   :  { %v1125_v27 = vpop.f32.mrf.mxu0 }
 0xc80   :  { %v1130_v39 = vmul.f32 0.5, %v1128_v24  ;;  %v1129_v40 = vadd.f32 %v1125_v27, %v427_v32 }
 0xc82   :  { %1615 = vtanh.f32 %v1130_v39  ;;  %v1142_v36 = vmul.f32 0.5, %v1129_v40 }
 0xc83   :  { %1617 = vtanh.f32 %v1129_v40 }
 0xc84   :  { %1619 = vtanh.f32 %v1142_v36 }
 0xc8f   :  { %v1616_v18 = vpop.eup %1615 }
 0xc90   :  { %v1132_v43 = vadd.f32 1.0, %v1616_v18  ;;  %v1618_v49 = vpop.eup %1617 }
 0xc91   :  { %v1620_v53 = vpop.eup %1619 }
 0xc92   :  { %v1133_v6 = vmul.f32 0.5, %v1132_v43  ;;  %v1144_v26 = vadd.f32 1.0, %v1620_v53 }
 0xc94   :  { %v1136_v55 = vmul.f32 %v1618_v49, %v1133_v6  ;;  %v1135_v51 = vmul.f32 %v1133_v6, %v2119_v11  ;;  %v1145_v5 = vmul.f32 0.5, %v1144_v26 }
 0xc96   :  { %1138 = vrot.lane.b32.xlu0 %v1136_v55, %s1624_s8 }
 0xc9a   :  { %1263 = vrot.lane.b32.xlu0 %v1245_v54, %s1624_s8 }
 0xd08   :  { %v1139_v4 = vpop.permute.xlu0 %1138 }
 0xd09   :  { %v1141_v10 = vadd.f32 %v1139_v4, %v1135_v51 }
 0xd0b   :  { %1621 = vtanh.f32 %v1141_v10 }
 0xd0c   :  { %v1264_v12 = vpop.permute.xlu0 %1263 }
 0xd0d   :  { %1535 = vmatmul.mubr.msk.f32.vlgmr.msra.gmra.mxu0 %vm300_vm2, %v1264_v12 }
 0xd18   :  { %v1622_v14 = vpop.eup %1621 }
 0xd19   :  { %v1147_v16 = vmul.f32 %v1622_v14, %v1145_v5 }
 0xd1b   :  { %1338 = vrot.lane.b32.xlu1 %v1147_v16, %s1624_s8 }
 0xd8d   :  { %v1339_v59 = vpop.permute.xlu1 %1338 }
 0xd8e   :  { %1554 = vmatmul.mubr.msk.f32.vlgmr.msra.gmra.mxu1 %vm300_vm2, %v1339_v59 }
 0xdcd   :  { %v1333_v47 = vpop.f32.mrf.mxu0 }
 0xdcf   :  { %v1536_v15 = vpop.f32.mrf.mxu0 }
 0xe4e   :  { %v1408_v17 = vpop.f32.mrf.mxu1 }
 0xe4f   :  { %v1409_v20 = vadd.f32 %v1408_v17, %v1333_v47 }
 0xe50   :  { %v1555_v21 = vpop.f32.mrf.mxu1 }
 0xe51   :  { %v1417_v61 = vadd.f32 %v1461_v19, %v1409_v20 }
 0xe53   :  { %1418 = vst [vmem:[%s2209_s5] sm:$0xff] %v1417_v61 }

</bundles_post_ra>
